<compile_context>
chip_gen: v5e
topology: v5e:2x2
jax: 0.10.0
libtpu: 0.0.40
codegen_flags: <defaults>
</compile_context>

<pallas_src>
import functools

import jax
import jax.numpy as jnp
from jax import lax
from jax.experimental import pallas as pl
from jax.experimental.pallas import tpu as pltpu


# ----------------------------------------------------------------------------
# Fused kernel: 3 LSTM layers + fc1 + three FC branches, single invocation.
# ----------------------------------------------------------------------------
def _fused_kernel(x_ref,
                  wih0_ref, whh0_ref, b0_ref,
                  wih1_ref, whh1_ref, b1_ref,
                  wih2_ref, whh2_ref, b2_ref,
                  wf1_ref, bf1_ref,
                  wb1_ref, bb1_ref,
                  wb2_ref, bb2_ref,
                  o_ref):
    Bp = o_ref.shape[0]                 # padded batch (multiple of 8 sublanes)
    T = x_ref.shape[0] // Bp            # static trip count (fully unrolled)
    H = whh0_ref.shape[0]

    def mm(a, w):
        return jnp.dot(a, w, preferred_element_type=jnp.float32)

    def lstm_layer(seq, wih_ref, whh_ref, b_ref, collect):
        # Hoisted input projection + combined bias: ONE matmul for all steps.
        gx = mm(seq, wih_ref[...]) + b_ref[...]          # (T*Bp, 4H)
        whh = whh_ref[...]                               # hoisted weight load
        h = jnp.zeros((Bp, H), jnp.float32)
        c = jnp.zeros((Bp, H), jnp.float32)
        outs = []
        for t in range(T):                               # static, fully unrolled
            g = gx[t * Bp:(t + 1) * Bp, :] + mm(h, whh)  # (Bp, 4H)
            sg = jax.nn.sigmoid(g)                       # one full-width EUP pass
            th = jnp.tanh(g)                             # one full-width EUP pass
            i_g = sg[:, 0 * H:1 * H]
            f_g = sg[:, 1 * H:2 * H]
            g_g = th[:, 2 * H:3 * H]
            o_g = sg[:, 3 * H:4 * H]
            c = f_g * c + i_g * g_g
            h = o_g * jnp.tanh(c)
            if collect:
                outs.append(h)
        if collect:
            return jnp.concatenate(outs, axis=0)         # (T*Bp, H) time-major
        return h                                         # last hidden state only

    seq1 = lstm_layer(x_ref[...], wih0_ref, whh0_ref, b0_ref, collect=True)
    seq2 = lstm_layer(seq1, wih1_ref, whh1_ref, b1_ref, collect=True)
    h_last = lstm_layer(seq2, wih2_ref, whh2_ref, b2_ref, collect=False)

    relu = lambda z: jnp.maximum(z, 0.0)
    # dropout: identity (eval mode)
    out = relu(mm(h_last, wf1_ref[...]) + bf1_ref[...])           # fc1 + relu
    a = relu(mm(out, wb1_ref[...]) + bb1_ref[...])                # fc1_1|fc2_1|fc3_1 fused
    z = mm(a, wb2_ref[...]) + bb2_ref[...]                        # block-diag fc1_2|fc2_2|fc3_2, lane-padded
    lane = lax.broadcasted_iota(jnp.int32, z.shape, 1)
    # relu applies to out1 (col 0) and out2 (col 1); out3 (cols 2:4) has no final relu.
    o_ref[...] = jnp.where(lane < 2, relu(z), z)


# ----------------------------------------------------------------------------
# Wrapper: pad / pack, one pallas_call, slice the lane-dense output slab.
# ----------------------------------------------------------------------------
@jax.jit
def three_layer_lstm_forward(x_bti, params):
    # x_bti: (B, T, input_size), batch_first like the PyTorch module.
    B, T, I = x_bti.shape
    H = params["lstm"][0]["whh_t"].shape[0]
    Hh = H // 2
    Bp = max(8, ((B + 7) // 8) * 8)     # pad batch to a sublane multiple
    OUT_PAD = 128                        # lane-dense output slab

    # Pad batch, go time-major, flatten (T, Bp) rows -> contiguous per-step slices.
    x_p = jnp.pad(x_bti.astype(jnp.float32), ((0, Bp - B), (0, 0), (0, 0)))
    x_tb = jnp.transpose(x_p, (1, 0, 2)).reshape(T * Bp, I)

    # Fuse the three branch-1 Linears into one matmul.
    wb1 = jnp.concatenate([params["w11_t"], params["w21_t"], params["w31_t"]], axis=1)  # (H, 3*Hh)
    bb1 = jnp.concatenate([params["b11"], params["b21"], params["b31"]]).reshape(1, 3 * Hh)
    # Fuse the three branch-2 Linears into one block-diagonal, lane-padded matmul.
    wb2 = jnp.zeros((3 * Hh, OUT_PAD), jnp.float32)
    wb2 = wb2.at[0:Hh, 0:1].set(params["w12_t"])
    wb2 = wb2.at[Hh:2 * Hh, 1:2].set(params["w22_t"])
    wb2 = wb2.at[2 * Hh:3 * Hh, 2:4].set(params["w32_t"])
    bb2 = jnp.zeros((1, OUT_PAD), jnp.float32)
    bb2 = bb2.at[0, 0].set(params["b12"][0])
    bb2 = bb2.at[0, 1].set(params["b22"][0])
    bb2 = bb2.at[0, 2:4].set(params["b32"])

    args = [x_tb]
    for lp in params["lstm"]:
        args += [lp["wih_t"], lp["whh_t"], lp["bias"].reshape(1, 4 * H)]
    args += [params["w1_t"], params["b1"].reshape(1, H), wb1, bb1, wb2, bb2]

    vmem = pl.BlockSpec(memory_space=pltpu.MemorySpace.VMEM)
    out = pl.pallas_call(
        _fused_kernel,
        out_shape=jax.ShapeDtypeStruct((Bp, OUT_PAD), jnp.float32),
        in_specs=[vmem] * len(args),
        out_specs=vmem,
    )(*args)

    o1 = out[:B, 0:1]
    o2 = out[:B, 1:2]
    o3 = out[:B, 2:4]
    return o1, o2, o3


# ----------------------------------------------------------------------------
# Deterministic parameter init + pure-JAX reference for a sanity check.
# ----------------------------------------------------------------------------
def init_params(key, input_size, hidden_size, num_layers):
    H = hidden_size
    keys = jax.random.split(key, 64)
    ki = iter(keys)
    u = lambda shape: jax.random.uniform(next(ki), shape, jnp.float32, -0.1, 0.1)

    lstm_layers = []
    for layer in range(num_layers):
        in_sz = input_size if layer == 0 else H
        w_ih = u((4 * H, in_sz))   # PyTorch weight_ih_l{k}
        w_hh = u((4 * H, H))       # PyTorch weight_hh_l{k}
        b_ih = u((4 * H,))
        b_hh = u((4 * H,))
        lstm_layers.append({
            "wih_t": w_ih.T,                # (in, 4H) pre-transposed for kernel
            "whh_t": w_hh.T,                # (H, 4H)
            "bias": b_ih + b_hh,            # combined bias
            "w_ih": w_ih, "w_hh": w_hh, "b_ih": b_ih, "b_hh": b_hh,
        })

    def linear(out_f, in_f):
        w = u((out_f, in_f))
        b = u((out_f,))
        return w, b

    w1, b1 = linear(H, H)
    w11, b11 = linear(H // 2, H)
    w12, b12 = linear(1, H // 2)
    w21, b21 = linear(H // 2, H)
    w22, b22 = linear(1, H // 2)
    w31, b31 = linear(H // 2, H)
    w32, b32 = linear(2, H // 2)

    return {
        "lstm": lstm_layers,
        "w1_t": w1.T, "b1": b1,
        "w11_t": w11.T, "b11": b11, "w12_t": w12.T, "b12": b12,
        "w21_t": w21.T, "b21": b21, "w22_t": w22.T, "b22": b22,
        "w31_t": w31.T, "b31": b31, "w32_t": w32.T, "b32": b32,
    }


def reference_forward(x_bti, params, num_layers, hidden_size):
    B, T, _ = x_bti.shape
    H = hidden_size
    seq = x_bti
    for layer in range(num_layers):
        lp = params["lstm"][layer]
        h = jnp.zeros((B, H), jnp.float32)
        c = jnp.zeros((B, H), jnp.float32)
        outs = []
        for t in range(T):
            g = seq[:, t, :] @ lp["w_ih"].T + lp["b_ih"] + h @ lp["w_hh"].T + lp["b_hh"]
            i_g = jax.nn.sigmoid(g[:, 0 * H:1 * H])
            f_g = jax.nn.sigmoid(g[:, 1 * H:2 * H])
            g_g = jnp.tanh(g[:, 2 * H:3 * H])
            o_g = jax.nn.sigmoid(g[:, 3 * H:4 * H])
            c = f_g * c + i_g * g_g
            h = o_g * jnp.tanh(c)
            outs.append(h)
        seq = jnp.stack(outs, axis=1)
    relu = lambda z: jnp.maximum(z, 0.0)
    out = relu(seq[:, -1, :] @ params["w1_t"] + params["b1"])
    o1 = relu(relu(out @ params["w11_t"] + params["b11"]) @ params["w12_t"] + params["b12"])
    o2 = relu(relu(out @ params["w21_t"] + params["b21"]) @ params["w22_t"] + params["b22"])
    o3 = relu(out @ params["w31_t"] + params["b31"]) @ params["w32_t"] + params["b32"]
    return o1, o2, o3


if __name__ == "__main__":
    INPUT_SIZE = 32
    HIDDEN_SIZE = 32
    NUM_LAYERS = 3
    BATCH = 2
    SEQ = 8

    key = jax.random.PRNGKey(0)
    k_x, k_p = jax.random.split(key)
    x = jax.random.normal(k_x, (BATCH, SEQ, INPUT_SIZE), jnp.float32)
    params = init_params(k_p, INPUT_SIZE, HIDDEN_SIZE, NUM_LAYERS)

    out1, out2, out3 = three_layer_lstm_forward(x, params)
    jax.block_until_ready((out1, out2, out3))

    r1, r2, r3 = reference_forward(x, params, NUM_LAYERS, HIDDEN_SIZE)
    assert out1.shape == (BATCH, 1) and out2.shape == (BATCH, 1) and out3.shape == (BATCH, 2)
    assert jnp.allclose(out1, r1, atol=1e-4)
    assert jnp.allclose(out2, r2, atol=1e-4)
    assert jnp.allclose(out3, r3, atol=1e-4)

    print("KERNEL_OK")
</pallas_src>

<mosaic_0001>
module attributes {stable_mosaic.version = 11 : i64} {
  func.func @_fused_kernel(%arg0: memref<64x32xf32, #tpu.memory_space<vmem>>, %arg1: memref<32x128xf32, #tpu.memory_space<vmem>>, %arg2: memref<32x128xf32, #tpu.memory_space<vmem>>, %arg3: memref<1x128xf32, #tpu.memory_space<vmem>>, %arg4: memref<32x128xf32, #tpu.memory_space<vmem>>, %arg5: memref<32x128xf32, #tpu.memory_space<vmem>>, %arg6: memref<1x128xf32, #tpu.memory_space<vmem>>, %arg7: memref<32x128xf32, #tpu.memory_space<vmem>>, %arg8: memref<32x128xf32, #tpu.memory_space<vmem>>, %arg9: memref<1x128xf32, #tpu.memory_space<vmem>>, %arg10: memref<32x32xf32, #tpu.memory_space<vmem>>, %arg11: memref<1x32xf32, #tpu.memory_space<vmem>>, %arg12: memref<32x48xf32, #tpu.memory_space<vmem>>, %arg13: memref<1x48xf32, #tpu.memory_space<vmem>>, %arg14: memref<48x128xf32, #tpu.memory_space<vmem>>, %arg15: memref<1x128xf32, #tpu.memory_space<vmem>>, %arg16: memref<8x128xf32, #tpu.memory_space<vmem>>) attributes {dimension_semantics = [], scalar_prefetch = 0 : i64, scratch_operands = 0 : i64, tpu.core_type = #tpu.core_type<tc>} {
    %c0 = arith.constant 0 : index
    %c0_0 = arith.constant 0 : index
    %0 = vector.load %arg0[%c0, %c0_0] : memref<64x32xf32, #tpu.memory_space<vmem>>, vector<64x32xf32>
    %c0_1 = arith.constant 0 : index
    %c0_2 = arith.constant 0 : index
    %1 = vector.load %arg1[%c0_1, %c0_2] : memref<32x128xf32, #tpu.memory_space<vmem>>, vector<32x128xf32>
    %cst = arith.constant dense<0.000000e+00> : vector<64x128xf32>
    %2 = tpu.matmul %0, %1, %cst {dimension_numbers = #tpu.dot_dimension_numbers<[1], [0], [0], [1], [0, 0, 1, 1], [], []>} : vector<64x32xf32>, vector<32x128xf32>, vector<64x128xf32> -> vector<64x128xf32>
    %c0_3 = arith.constant 0 : index
    %c0_4 = arith.constant 0 : index
    %3 = vector.load %arg3[%c0_3, %c0_4] : memref<1x128xf32, #tpu.memory_space<vmem>>, vector<1x128xf32>
    %4 = vector.broadcast %3 : vector<1x128xf32> to vector<64x128xf32>
    %5 = arith.addf %2, %4 : vector<64x128xf32>
    %c0_5 = arith.constant 0 : index
    %c0_6 = arith.constant 0 : index
    %6 = vector.load %arg2[%c0_5, %c0_6] : memref<32x128xf32, #tpu.memory_space<vmem>>, vector<32x128xf32>
    %cst_7 = arith.constant 0.000000e+00 : f32
    %7 = vector.broadcast %cst_7 : f32 to vector<8x32xf32>
    %cst_8 = arith.constant 0.000000e+00 : f32
    %8 = vector.broadcast %cst_8 : f32 to vector<8x32xf32>
    %9 = vector.extract_strided_slice %5 {offsets = [0, 0], sizes = [8, 128], strides = [1, 1]} : vector<64x128xf32> to vector<8x128xf32>
    %cst_9 = arith.constant dense<0.000000e+00> : vector<8x128xf32>
    %10 = tpu.matmul %7, %6, %cst_9 {dimension_numbers = #tpu.dot_dimension_numbers<[1], [0], [0], [1], [0, 0, 1, 1], [], []>} : vector<8x32xf32>, vector<32x128xf32>, vector<8x128xf32> -> vector<8x128xf32>
    %11 = arith.addf %9, %10 : vector<8x128xf32>
    %12 = arith.negf %11 : vector<8x128xf32>
    %13 = math.exp %12 : vector<8x128xf32>
    %cst_10 = arith.constant 1.000000e+00 : f32
    %14 = vector.broadcast %cst_10 : f32 to vector<8x128xf32>
    %15 = arith.addf %14, %13 : vector<8x128xf32>
    %16 = arith.divf %14, %15 : vector<8x128xf32>
    %17 = math.tanh %11 : vector<8x128xf32>
    %18 = vector.extract_strided_slice %16 {offsets = [0, 0], sizes = [8, 32], strides = [1, 1]} : vector<8x128xf32> to vector<8x32xf32>
    %19 = vector.extract_strided_slice %16 {offsets = [0, 32], sizes = [8, 32], strides = [1, 1]} : vector<8x128xf32> to vector<8x32xf32>
    %20 = vector.extract_strided_slice %17 {offsets = [0, 64], sizes = [8, 32], strides = [1, 1]} : vector<8x128xf32> to vector<8x32xf32>
    %21 = vector.extract_strided_slice %16 {offsets = [0, 96], sizes = [8, 32], strides = [1, 1]} : vector<8x128xf32> to vector<8x32xf32>
    %22 = arith.mulf %19, %8 : vector<8x32xf32>
    %23 = arith.mulf %18, %20 : vector<8x32xf32>
    %24 = arith.addf %22, %23 : vector<8x32xf32>
    %25 = math.tanh %24 : vector<8x32xf32>
    %26 = arith.mulf %21, %25 : vector<8x32xf32>
    %27 = vector.extract_strided_slice %5 {offsets = [8, 0], sizes = [8, 128], strides = [1, 1]} : vector<64x128xf32> to vector<8x128xf32>
    %cst_11 = arith.constant dense<0.000000e+00> : vector<8x128xf32>
    %28 = tpu.matmul %26, %6, %cst_11 {dimension_numbers = #tpu.dot_dimension_numbers<[1], [0], [0], [1], [0, 0, 1, 1], [], []>} : vector<8x32xf32>, vector<32x128xf32>, vector<8x128xf32> -> vector<8x128xf32>
    %29 = arith.addf %27, %28 : vector<8x128xf32>
    %30 = arith.negf %29 : vector<8x128xf32>
    %31 = math.exp %30 : vector<8x128xf32>
    %cst_12 = arith.constant 1.000000e+00 : f32
    %32 = vector.broadcast %cst_12 : f32 to vector<8x128xf32>
    %33 = arith.addf %32, %31 : vector<8x128xf32>
    %34 = arith.divf %32, %33 : vector<8x128xf32>
    %35 = math.tanh %29 : vector<8x128xf32>
    %36 = vector.extract_strided_slice %34 {offsets = [0, 0], sizes = [8, 32], strides = [1, 1]} : vector<8x128xf32> to vector<8x32xf32>
    %37 = vector.extract_strided_slice %34 {offsets = [0, 32], sizes = [8, 32], strides = [1, 1]} : vector<8x128xf32> to vector<8x32xf32>
    %38 = vector.extract_strided_slice %35 {offsets = [0, 64], sizes = [8, 32], strides = [1, 1]} : vector<8x128xf32> to vector<8x32xf32>
    %39 = vector.extract_strided_slice %34 {offsets = [0, 96], sizes = [8, 32], strides = [1, 1]} : vector<8x128xf32> to vector<8x32xf32>
    %40 = arith.mulf %37, %24 : vector<8x32xf32>
    %41 = arith.mulf %36, %38 : vector<8x32xf32>
    %42 = arith.addf %40, %41 : vector<8x32xf32>
    %43 = math.tanh %42 : vector<8x32xf32>
    %44 = arith.mulf %39, %43 : vector<8x32xf32>
    %45 = vector.extract_strided_slice %5 {offsets = [16, 0], sizes = [8, 128], strides = [1, 1]} : vector<64x128xf32> to vector<8x128xf32>
    %cst_13 = arith.constant dense<0.000000e+00> : vector<8x128xf32>
    %46 = tpu.matmul %44, %6, %cst_13 {dimension_numbers = #tpu.dot_dimension_numbers<[1], [0], [0], [1], [0, 0, 1, 1], [], []>} : vector<8x32xf32>, vector<32x128xf32>, vector<8x128xf32> -> vector<8x128xf32>
    %47 = arith.addf %45, %46 : vector<8x128xf32>
    %48 = arith.negf %47 : vector<8x128xf32>
    %49 = math.exp %48 : vector<8x128xf32>
    %cst_14 = arith.constant 1.000000e+00 : f32
    %50 = vector.broadcast %cst_14 : f32 to vector<8x128xf32>
    %51 = arith.addf %50, %49 : vector<8x128xf32>
    %52 = arith.divf %50, %51 : vector<8x128xf32>
    %53 = math.tanh %47 : vector<8x128xf32>
    %54 = vector.extract_strided_slice %52 {offsets = [0, 0], sizes = [8, 32], strides = [1, 1]} : vector<8x128xf32> to vector<8x32xf32>
    %55 = vector.extract_strided_slice %52 {offsets = [0, 32], sizes = [8, 32], strides = [1, 1]} : vector<8x128xf32> to vector<8x32xf32>
    %56 = vector.extract_strided_slice %53 {offsets = [0, 64], sizes = [8, 32], strides = [1, 1]} : vector<8x128xf32> to vector<8x32xf32>
    %57 = vector.extract_strided_slice %52 {offsets = [0, 96], sizes = [8, 32], strides = [1, 1]} : vector<8x128xf32> to vector<8x32xf32>
    %58 = arith.mulf %55, %42 : vector<8x32xf32>
    %59 = arith.mulf %54, %56 : vector<8x32xf32>
    %60 = arith.addf %58, %59 : vector<8x32xf32>
    %61 = math.tanh %60 : vector<8x32xf32>
    %62 = arith.mulf %57, %61 : vector<8x32xf32>
    %63 = vector.extract_strided_slice %5 {offsets = [24, 0], sizes = [8, 128], strides = [1, 1]} : vector<64x128xf32> to vector<8x128xf32>
    %cst_15 = arith.constant dense<0.000000e+00> : vector<8x128xf32>
    %64 = tpu.matmul %62, %6, %cst_15 {dimension_numbers = #tpu.dot_dimension_numbers<[1], [0], [0], [1], [0, 0, 1, 1], [], []>} : vector<8x32xf32>, vector<32x128xf32>, vector<8x128xf32> -> vector<8x128xf32>
    %65 = arith.addf %63, %64 : vector<8x128xf32>
    %66 = arith.negf %65 : vector<8x128xf32>
    %67 = math.exp %66 : vector<8x128xf32>
    %cst_16 = arith.constant 1.000000e+00 : f32
    %68 = vector.broadcast %cst_16 : f32 to vector<8x128xf32>
    %69 = arith.addf %68, %67 : vector<8x128xf32>
    %70 = arith.divf %68, %69 : vector<8x128xf32>
    %71 = math.tanh %65 : vector<8x128xf32>
    %72 = vector.extract_strided_slice %70 {offsets = [0, 0], sizes = [8, 32], strides = [1, 1]} : vector<8x128xf32> to vector<8x32xf32>
    %73 = vector.extract_strided_slice %70 {offsets = [0, 32], sizes = [8, 32], strides = [1, 1]} : vector<8x128xf32> to vector<8x32xf32>
    %74 = vector.extract_strided_slice %71 {offsets = [0, 64], sizes = [8, 32], strides = [1, 1]} : vector<8x128xf32> to vector<8x32xf32>
    %75 = vector.extract_strided_slice %70 {offsets = [0, 96], sizes = [8, 32], strides = [1, 1]} : vector<8x128xf32> to vector<8x32xf32>
    %76 = arith.mulf %73, %60 : vector<8x32xf32>
    %77 = arith.mulf %72, %74 : vector<8x32xf32>
    %78 = arith.addf %76, %77 : vector<8x32xf32>
    %79 = math.tanh %78 : vector<8x32xf32>
    %80 = arith.mulf %75, %79 : vector<8x32xf32>
    %81 = vector.extract_strided_slice %5 {offsets = [32, 0], sizes = [8, 128], strides = [1, 1]} : vector<64x128xf32> to vector<8x128xf32>
    %cst_17 = arith.constant dense<0.000000e+00> : vector<8x128xf32>
    %82 = tpu.matmul %80, %6, %cst_17 {dimension_numbers = #tpu.dot_dimension_numbers<[1], [0], [0], [1], [0, 0, 1, 1], [], []>} : vector<8x32xf32>, vector<32x128xf32>, vector<8x128xf32> -> vector<8x128xf32>
    %83 = arith.addf %81, %82 : vector<8x128xf32>
    %84 = arith.negf %83 : vector<8x128xf32>
    %85 = math.exp %84 : vector<8x128xf32>
    %cst_18 = arith.constant 1.000000e+00 : f32
    %86 = vector.broadcast %cst_18 : f32 to vector<8x128xf32>
    %87 = arith.addf %86, %85 : vector<8x128xf32>
    %88 = arith.divf %86, %87 : vector<8x128xf32>
    %89 = math.tanh %83 : vector<8x128xf32>
    %90 = vector.extract_strided_slice %88 {offsets = [0, 0], sizes = [8, 32], strides = [1, 1]} : vector<8x128xf32> to vector<8x32xf32>
    %91 = vector.extract_strided_slice %88 {offsets = [0, 32], sizes = [8, 32], strides = [1, 1]} : vector<8x128xf32> to vector<8x32xf32>
    %92 = vector.extract_strided_slice %89 {offsets = [0, 64], sizes = [8, 32], strides = [1, 1]} : vector<8x128xf32> to vector<8x32xf32>
    %93 = vector.extract_strided_slice %88 {offsets = [0, 96], sizes = [8, 32], strides = [1, 1]} : vector<8x128xf32> to vector<8x32xf32>
    %94 = arith.mulf %91, %78 : vector<8x32xf32>
    %95 = arith.mulf %90, %92 : vector<8x32xf32>
    %96 = arith.addf %94, %95 : vector<8x32xf32>
    %97 = math.tanh %96 : vector<8x32xf32>
    %98 = arith.mulf %93, %97 : vector<8x32xf32>
    %99 = vector.extract_strided_slice %5 {offsets = [40, 0], sizes = [8, 128], strides = [1, 1]} : vector<64x128xf32> to vector<8x128xf32>
    %cst_19 = arith.constant dense<0.000000e+00> : vector<8x128xf32>
    %100 = tpu.matmul %98, %6, %cst_19 {dimension_numbers = #tpu.dot_dimension_numbers<[1], [0], [0], [1], [0, 0, 1, 1], [], []>} : vector<8x32xf32>, vector<32x128xf32>, vector<8x128xf32> -> vector<8x128xf32>
    %101 = arith.addf %99, %100 : vector<8x128xf32>
    %102 = arith.negf %101 : vector<8x128xf32>
    %103 = math.exp %102 : vector<8x128xf32>
    %cst_20 = arith.constant 1.000000e+00 : f32
    %104 = vector.broadcast %cst_20 : f32 to vector<8x128xf32>
    %105 = arith.addf %104, %103 : vector<8x128xf32>
    %106 = arith.divf %104, %105 : vector<8x128xf32>
    %107 = math.tanh %101 : vector<8x128xf32>
    %108 = vector.extract_strided_slice %106 {offsets = [0, 0], sizes = [8, 32], strides = [1, 1]} : vector<8x128xf32> to vector<8x32xf32>
    %109 = vector.extract_strided_slice %106 {offsets = [0, 32], sizes = [8, 32], strides = [1, 1]} : vector<8x128xf32> to vector<8x32xf32>
    %110 = vector.extract_strided_slice %107 {offsets = [0, 64], sizes = [8, 32], strides = [1, 1]} : vector<8x128xf32> to vector<8x32xf32>
    %111 = vector.extract_strided_slice %106 {offsets = [0, 96], sizes = [8, 32], strides = [1, 1]} : vector<8x128xf32> to vector<8x32xf32>
    %112 = arith.mulf %109, %96 : vector<8x32xf32>
    %113 = arith.mulf %108, %110 : vector<8x32xf32>
    %114 = arith.addf %112, %113 : vector<8x32xf32>
    %115 = math.tanh %114 : vector<8x32xf32>
    %116 = arith.mulf %111, %115 : vector<8x32xf32>
    %117 = vector.extract_strided_slice %5 {offsets = [48, 0], sizes = [8, 128], strides = [1, 1]} : vector<64x128xf32> to vector<8x128xf32>
    %cst_21 = arith.constant dense<0.000000e+00> : vector<8x128xf32>
    %118 = tpu.matmul %116, %6, %cst_21 {dimension_numbers = #tpu.dot_dimension_numbers<[1], [0], [0], [1], [0, 0, 1, 1], [], []>} : vector<8x32xf32>, vector<32x128xf32>, vector<8x128xf32> -> vector<8x128xf32>
    %119 = arith.addf %117, %118 : vector<8x128xf32>
    %120 = arith.negf %119 : vector<8x128xf32>
    %121 = math.exp %120 : vector<8x128xf32>
    %cst_22 = arith.constant 1.000000e+00 : f32
    %122 = vector.broadcast %cst_22 : f32 to vector<8x128xf32>
    %123 = arith.addf %122, %121 : vector<8x128xf32>
    %124 = arith.divf %122, %123 : vector<8x128xf32>
    %125 = math.tanh %119 : vector<8x128xf32>
    %126 = vector.extract_strided_slice %124 {offsets = [0, 0], sizes = [8, 32], strides = [1, 1]} : vector<8x128xf32> to vector<8x32xf32>
    %127 = vector.extract_strided_slice %124 {offsets = [0, 32], sizes = [8, 32], strides = [1, 1]} : vector<8x128xf32> to vector<8x32xf32>
    %128 = vector.extract_strided_slice %125 {offsets = [0, 64], sizes = [8, 32], strides = [1, 1]} : vector<8x128xf32> to vector<8x32xf32>
    %129 = vector.extract_strided_slice %124 {offsets = [0, 96], sizes = [8, 32], strides = [1, 1]} : vector<8x128xf32> to vector<8x32xf32>
    %130 = arith.mulf %127, %114 : vector<8x32xf32>
    %131 = arith.mulf %126, %128 : vector<8x32xf32>
    %132 = arith.addf %130, %131 : vector<8x32xf32>
    %133 = math.tanh %132 : vector<8x32xf32>
    %134 = arith.mulf %129, %133 : vector<8x32xf32>
    %135 = vector.extract_strided_slice %5 {offsets = [56, 0], sizes = [8, 128], strides = [1, 1]} : vector<64x128xf32> to vector<8x128xf32>
    %cst_23 = arith.constant dense<0.000000e+00> : vector<8x128xf32>
    %136 = tpu.matmul %134, %6, %cst_23 {dimension_numbers = #tpu.dot_dimension_numbers<[1], [0], [0], [1], [0, 0, 1, 1], [], []>} : vector<8x32xf32>, vector<32x128xf32>, vector<8x128xf32> -> vector<8x128xf32>
    %137 = arith.addf %135, %136 : vector<8x128xf32>
    %138 = arith.negf %137 : vector<8x128xf32>
    %139 = math.exp %138 : vector<8x128xf32>
    %cst_24 = arith.constant 1.000000e+00 : f32
    %140 = vector.broadcast %cst_24 : f32 to vector<8x128xf32>
    %141 = arith.addf %140, %139 : vector<8x128xf32>
    %142 = arith.divf %140, %141 : vector<8x128xf32>
    %143 = math.tanh %137 : vector<8x128xf32>
    %144 = vector.extract_strided_slice %142 {offsets = [0, 0], sizes = [8, 32], strides = [1, 1]} : vector<8x128xf32> to vector<8x32xf32>
    %145 = vector.extract_strided_slice %142 {offsets = [0, 32], sizes = [8, 32], strides = [1, 1]} : vector<8x128xf32> to vector<8x32xf32>
    %146 = vector.extract_strided_slice %143 {offsets = [0, 64], sizes = [8, 32], strides = [1, 1]} : vector<8x128xf32> to vector<8x32xf32>
    %147 = vector.extract_strided_slice %142 {offsets = [0, 96], sizes = [8, 32], strides = [1, 1]} : vector<8x128xf32> to vector<8x32xf32>
    %148 = arith.mulf %145, %132 : vector<8x32xf32>
    %149 = arith.mulf %144, %146 : vector<8x32xf32>
    %150 = arith.addf %148, %149 : vector<8x32xf32>
    %151 = math.tanh %150 : vector<8x32xf32>
    %152 = arith.mulf %147, %151 : vector<8x32xf32>
    %153 = tpu.concatenate %26, %44, %62, %80, %98, %116, %134, %152 in 0 : vector<8x32xf32>, vector<8x32xf32>, vector<8x32xf32>, vector<8x32xf32>, vector<8x32xf32>, vector<8x32xf32>, vector<8x32xf32>, vector<8x32xf32> -> vector<64x32xf32>
    %c0_25 = arith.constant 0 : index
    %c0_26 = arith.constant 0 : index
    %154 = vector.load %arg4[%c0_25, %c0_26] : memref<32x128xf32, #tpu.memory_space<vmem>>, vector<32x128xf32>
    %cst_27 = arith.constant dense<0.000000e+00> : vector<64x128xf32>
    %155 = tpu.matmul %153, %154, %cst_27 {dimension_numbers = #tpu.dot_dimension_numbers<[1], [0], [0], [1], [0, 0, 1, 1], [], []>} : vector<64x32xf32>, vector<32x128xf32>, vector<64x128xf32> -> vector<64x128xf32>
    %c0_28 = arith.constant 0 : index
    %c0_29 = arith.constant 0 : index
    %156 = vector.load %arg6[%c0_28, %c0_29] : memref<1x128xf32, #tpu.memory_space<vmem>>, vector<1x128xf32>
    %157 = vector.broadcast %156 : vector<1x128xf32> to vector<64x128xf32>
    %158 = arith.addf %155, %157 : vector<64x128xf32>
    %c0_30 = arith.constant 0 : index
    %c0_31 = arith.constant 0 : index
    %159 = vector.load %arg5[%c0_30, %c0_31] : memref<32x128xf32, #tpu.memory_space<vmem>>, vector<32x128xf32>
    %cst_32 = arith.constant 0.000000e+00 : f32
    %160 = vector.broadcast %cst_32 : f32 to vector<8x32xf32>
    %cst_33 = arith.constant 0.000000e+00 : f32
    %161 = vector.broadcast %cst_33 : f32 to vector<8x32xf32>
    %162 = vector.extract_strided_slice %158 {offsets = [0, 0], sizes = [8, 128], strides = [1, 1]} : vector<64x128xf32> to vector<8x128xf32>
    %cst_34 = arith.constant dense<0.000000e+00> : vector<8x128xf32>
    %163 = tpu.matmul %160, %159, %cst_34 {dimension_numbers = #tpu.dot_dimension_numbers<[1], [0], [0], [1], [0, 0, 1, 1], [], []>} : vector<8x32xf32>, vector<32x128xf32>, vector<8x128xf32> -> vector<8x128xf32>
    %164 = arith.addf %162, %163 : vector<8x128xf32>
    %165 = arith.negf %164 : vector<8x128xf32>
    %166 = math.exp %165 : vector<8x128xf32>
    %cst_35 = arith.constant 1.000000e+00 : f32
    %167 = vector.broadcast %cst_35 : f32 to vector<8x128xf32>
    %168 = arith.addf %167, %166 : vector<8x128xf32>
    %169 = arith.divf %167, %168 : vector<8x128xf32>
    %170 = math.tanh %164 : vector<8x128xf32>
    %171 = vector.extract_strided_slice %169 {offsets = [0, 0], sizes = [8, 32], strides = [1, 1]} : vector<8x128xf32> to vector<8x32xf32>
    %172 = vector.extract_strided_slice %169 {offsets = [0, 32], sizes = [8, 32], strides = [1, 1]} : vector<8x128xf32> to vector<8x32xf32>
    %173 = vector.extract_strided_slice %170 {offsets = [0, 64], sizes = [8, 32], strides = [1, 1]} : vector<8x128xf32> to vector<8x32xf32>
    %174 = vector.extract_strided_slice %169 {offsets = [0, 96], sizes = [8, 32], strides = [1, 1]} : vector<8x128xf32> to vector<8x32xf32>
    %175 = arith.mulf %172, %161 : vector<8x32xf32>
    %176 = arith.mulf %171, %173 : vector<8x32xf32>
    %177 = arith.addf %175, %176 : vector<8x32xf32>
    %178 = math.tanh %177 : vector<8x32xf32>
    %179 = arith.mulf %174, %178 : vector<8x32xf32>
    %180 = vector.extract_strided_slice %158 {offsets = [8, 0], sizes = [8, 128], strides = [1, 1]} : vector<64x128xf32> to vector<8x128xf32>
    %cst_36 = arith.constant dense<0.000000e+00> : vector<8x128xf32>
    %181 = tpu.matmul %179, %159, %cst_36 {dimension_numbers = #tpu.dot_dimension_numbers<[1], [0], [0], [1], [0, 0, 1, 1], [], []>} : vector<8x32xf32>, vector<32x128xf32>, vector<8x128xf32> -> vector<8x128xf32>
    %182 = arith.addf %180, %181 : vector<8x128xf32>
    %183 = arith.negf %182 : vector<8x128xf32>
    %184 = math.exp %183 : vector<8x128xf32>
    %cst_37 = arith.constant 1.000000e+00 : f32
    %185 = vector.broadcast %cst_37 : f32 to vector<8x128xf32>
    %186 = arith.addf %185, %184 : vector<8x128xf32>
    %187 = arith.divf %185, %186 : vector<8x128xf32>
    %188 = math.tanh %182 : vector<8x128xf32>
    %189 = vector.extract_strided_slice %187 {offsets = [0, 0], sizes = [8, 32], strides = [1, 1]} : vector<8x128xf32> to vector<8x32xf32>
    %190 = vector.extract_strided_slice %187 {offsets = [0, 32], sizes = [8, 32], strides = [1, 1]} : vector<8x128xf32> to vector<8x32xf32>
    %191 = vector.extract_strided_slice %188 {offsets = [0, 64], sizes = [8, 32], strides = [1, 1]} : vector<8x128xf32> to vector<8x32xf32>
    %192 = vector.extract_strided_slice %187 {offsets = [0, 96], sizes = [8, 32], strides = [1, 1]} : vector<8x128xf32> to vector<8x32xf32>
    %193 = arith.mulf %190, %177 : vector<8x32xf32>
    %194 = arith.mulf %189, %191 : vector<8x32xf32>
    %195 = arith.addf %193, %194 : vector<8x32xf32>
    %196 = math.tanh %195 : vector<8x32xf32>
    %197 = arith.mulf %192, %196 : vector<8x32xf32>
    %198 = vector.extract_strided_slice %158 {offsets = [16, 0], sizes = [8, 128], strides = [1, 1]} : vector<64x128xf32> to vector<8x128xf32>
    %cst_38 = arith.constant dense<0.000000e+00> : vector<8x128xf32>
    %199 = tpu.matmul %197, %159, %cst_38 {dimension_numbers = #tpu.dot_dimension_numbers<[1], [0], [0], [1], [0, 0, 1, 1], [], []>} : vector<8x32xf32>, vector<32x128xf32>, vector<8x128xf32> -> vector<8x128xf32>
    %200 = arith.addf %198, %199 : vector<8x128xf32>
    %201 = arith.negf %200 : vector<8x128xf32>
    %202 = math.exp %201 : vector<8x128xf32>
    %cst_39 = arith.constant 1.000000e+00 : f32
    %203 = vector.broadcast %cst_39 : f32 to vector<8x128xf32>
    %204 = arith.addf %203, %202 : vector<8x128xf32>
    %205 = arith.divf %203, %204 : vector<8x128xf32>
    %206 = math.tanh %200 : vector<8x128xf32>
    %207 = vector.extract_strided_slice %205 {offsets = [0, 0], sizes = [8, 32], strides = [1, 1]} : vector<8x128xf32> to vector<8x32xf32>
    %208 = vector.extract_strided_slice %205 {offsets = [0, 32], sizes = [8, 32], strides = [1, 1]} : vector<8x128xf32> to vector<8x32xf32>
    %209 = vector.extract_strided_slice %206 {offsets = [0, 64], sizes = [8, 32], strides = [1, 1]} : vector<8x128xf32> to vector<8x32xf32>
    %210 = vector.extract_strided_slice %205 {offsets = [0, 96], sizes = [8, 32], strides = [1, 1]} : vector<8x128xf32> to vector<8x32xf32>
    %211 = arith.mulf %208, %195 : vector<8x32xf32>
    %212 = arith.mulf %207, %209 : vector<8x32xf32>
    %213 = arith.addf %211, %212 : vector<8x32xf32>
    %214 = math.tanh %213 : vector<8x32xf32>
    %215 = arith.mulf %210, %214 : vector<8x32xf32>
    %216 = vector.extract_strided_slice %158 {offsets = [24, 0], sizes = [8, 128], strides = [1, 1]} : vector<64x128xf32> to vector<8x128xf32>
    %cst_40 = arith.constant dense<0.000000e+00> : vector<8x128xf32>
    %217 = tpu.matmul %215, %159, %cst_40 {dimension_numbers = #tpu.dot_dimension_numbers<[1], [0], [0], [1], [0, 0, 1, 1], [], []>} : vector<8x32xf32>, vector<32x128xf32>, vector<8x128xf32> -> vector<8x128xf32>
    %218 = arith.addf %216, %217 : vector<8x128xf32>
    %219 = arith.negf %218 : vector<8x128xf32>
    %220 = math.exp %219 : vector<8x128xf32>
    %cst_41 = arith.constant 1.000000e+00 : f32
    %221 = vector.broadcast %cst_41 : f32 to vector<8x128xf32>
    %222 = arith.addf %221, %220 : vector<8x128xf32>
    %223 = arith.divf %221, %222 : vector<8x128xf32>
    %224 = math.tanh %218 : vector<8x128xf32>
    %225 = vector.extract_strided_slice %223 {offsets = [0, 0], sizes = [8, 32], strides = [1, 1]} : vector<8x128xf32> to vector<8x32xf32>
    %226 = vector.extract_strided_slice %223 {offsets = [0, 32], sizes = [8, 32], strides = [1, 1]} : vector<8x128xf32> to vector<8x32xf32>
    %227 = vector.extract_strided_slice %224 {offsets = [0, 64], sizes = [8, 32], strides = [1, 1]} : vector<8x128xf32> to vector<8x32xf32>
    %228 = vector.extract_strided_slice %223 {offsets = [0, 96], sizes = [8, 32], strides = [1, 1]} : vector<8x128xf32> to vector<8x32xf32>
    %229 = arith.mulf %226, %213 : vector<8x32xf32>
    %230 = arith.mulf %225, %227 : vector<8x32xf32>
    %231 = arith.addf %229, %230 : vector<8x32xf32>
    %232 = math.tanh %231 : vector<8x32xf32>
    %233 = arith.mulf %228, %232 : vector<8x32xf32>
    %234 = vector.extract_strided_slice %158 {offsets = [32, 0], sizes = [8, 128], strides = [1, 1]} : vector<64x128xf32> to vector<8x128xf32>
    %cst_42 = arith.constant dense<0.000000e+00> : vector<8x128xf32>
    %235 = tpu.matmul %233, %159, %cst_42 {dimension_numbers = #tpu.dot_dimension_numbers<[1], [0], [0], [1], [0, 0, 1, 1], [], []>} : vector<8x32xf32>, vector<32x128xf32>, vector<8x128xf32> -> vector<8x128xf32>
    %236 = arith.addf %234, %235 : vector<8x128xf32>
    %237 = arith.negf %236 : vector<8x128xf32>
    %238 = math.exp %237 : vector<8x128xf32>
    %cst_43 = arith.constant 1.000000e+00 : f32
    %239 = vector.broadcast %cst_43 : f32 to vector<8x128xf32>
    %240 = arith.addf %239, %238 : vector<8x128xf32>
    %241 = arith.divf %239, %240 : vector<8x128xf32>
    %242 = math.tanh %236 : vector<8x128xf32>
    %243 = vector.extract_strided_slice %241 {offsets = [0, 0], sizes = [8, 32], strides = [1, 1]} : vector<8x128xf32> to vector<8x32xf32>
    %244 = vector.extract_strided_slice %241 {offsets = [0, 32], sizes = [8, 32], strides = [1, 1]} : vector<8x128xf32> to vector<8x32xf32>
    %245 = vector.extract_strided_slice %242 {offsets = [0, 64], sizes = [8, 32], strides = [1, 1]} : vector<8x128xf32> to vector<8x32xf32>
    %246 = vector.extract_strided_slice %241 {offsets = [0, 96], sizes = [8, 32], strides = [1, 1]} : vector<8x128xf32> to vector<8x32xf32>
    %247 = arith.mulf %244, %231 : vector<8x32xf32>
    %248 = arith.mulf %243, %245 : vector<8x32xf32>
    %249 = arith.addf %247, %248 : vector<8x32xf32>
    %250 = math.tanh %249 : vector<8x32xf32>
    %251 = arith.mulf %246, %250 : vector<8x32xf32>
    %252 = vector.extract_strided_slice %158 {offsets = [40, 0], sizes = [8, 128], strides = [1, 1]} : vector<64x128xf32> to vector<8x128xf32>
    %cst_44 = arith.constant dense<0.000000e+00> : vector<8x128xf32>
    %253 = tpu.matmul %251, %159, %cst_44 {dimension_numbers = #tpu.dot_dimension_numbers<[1], [0], [0], [1], [0, 0, 1, 1], [], []>} : vector<8x32xf32>, vector<32x128xf32>, vector<8x128xf32> -> vector<8x128xf32>
    %254 = arith.addf %252, %253 : vector<8x128xf32>
    %255 = arith.negf %254 : vector<8x128xf32>
    %256 = math.exp %255 : vector<8x128xf32>
    %cst_45 = arith.constant 1.000000e+00 : f32
    %257 = vector.broadcast %cst_45 : f32 to vector<8x128xf32>
    %258 = arith.addf %257, %256 : vector<8x128xf32>
    %259 = arith.divf %257, %258 : vector<8x128xf32>
    %260 = math.tanh %254 : vector<8x128xf32>
    %261 = vector.extract_strided_slice %259 {offsets = [0, 0], sizes = [8, 32], strides = [1, 1]} : vector<8x128xf32> to vector<8x32xf32>
    %262 = vector.extract_strided_slice %259 {offsets = [0, 32], sizes = [8, 32], strides = [1, 1]} : vector<8x128xf32> to vector<8x32xf32>
    %263 = vector.extract_strided_slice %260 {offsets = [0, 64], sizes = [8, 32], strides = [1, 1]} : vector<8x128xf32> to vector<8x32xf32>
    %264 = vector.extract_strided_slice %259 {offsets = [0, 96], sizes = [8, 32], strides = [1, 1]} : vector<8x128xf32> to vector<8x32xf32>
    %265 = arith.mulf %262, %249 : vector<8x32xf32>
    %266 = arith.mulf %261, %263 : vector<8x32xf32>
    %267 = arith.addf %265, %266 : vector<8x32xf32>
    %268 = math.tanh %267 : vector<8x32xf32>
    %269 = arith.mulf %264, %268 : vector<8x32xf32>
    %270 = vector.extract_strided_slice %158 {offsets = [48, 0], sizes = [8, 128], strides = [1, 1]} : vector<64x128xf32> to vector<8x128xf32>
    %cst_46 = arith.constant dense<0.000000e+00> : vector<8x128xf32>
    %271 = tpu.matmul %269, %159, %cst_46 {dimension_numbers = #tpu.dot_dimension_numbers<[1], [0], [0], [1], [0, 0, 1, 1], [], []>} : vector<8x32xf32>, vector<32x128xf32>, vector<8x128xf32> -> vector<8x128xf32>
    %272 = arith.addf %270, %271 : vector<8x128xf32>
    %273 = arith.negf %272 : vector<8x128xf32>
    %274 = math.exp %273 : vector<8x128xf32>
    %cst_47 = arith.constant 1.000000e+00 : f32
    %275 = vector.broadcast %cst_47 : f32 to vector<8x128xf32>
    %276 = arith.addf %275, %274 : vector<8x128xf32>
    %277 = arith.divf %275, %276 : vector<8x128xf32>
    %278 = math.tanh %272 : vector<8x128xf32>
    %279 = vector.extract_strided_slice %277 {offsets = [0, 0], sizes = [8, 32], strides = [1, 1]} : vector<8x128xf32> to vector<8x32xf32>
    %280 = vector.extract_strided_slice %277 {offsets = [0, 32], sizes = [8, 32], strides = [1, 1]} : vector<8x128xf32> to vector<8x32xf32>
    %281 = vector.extract_strided_slice %278 {offsets = [0, 64], sizes = [8, 32], strides = [1, 1]} : vector<8x128xf32> to vector<8x32xf32>
    %282 = vector.extract_strided_slice %277 {offsets = [0, 96], sizes = [8, 32], strides = [1, 1]} : vector<8x128xf32> to vector<8x32xf32>
    %283 = arith.mulf %280, %267 : vector<8x32xf32>
    %284 = arith.mulf %279, %281 : vector<8x32xf32>
    %285 = arith.addf %283, %284 : vector<8x32xf32>
    %286 = math.tanh %285 : vector<8x32xf32>
    %287 = arith.mulf %282, %286 : vector<8x32xf32>
    %288 = vector.extract_strided_slice %158 {offsets = [56, 0], sizes = [8, 128], strides = [1, 1]} : vector<64x128xf32> to vector<8x128xf32>
    %cst_48 = arith.constant dense<0.000000e+00> : vector<8x128xf32>
    %289 = tpu.matmul %287, %159, %cst_48 {dimension_numbers = #tpu.dot_dimension_numbers<[1], [0], [0], [1], [0, 0, 1, 1], [], []>} : vector<8x32xf32>, vector<32x128xf32>, vector<8x128xf32> -> vector<8x128xf32>
    %290 = arith.addf %288, %289 : vector<8x128xf32>
    %291 = arith.negf %290 : vector<8x128xf32>
    %292 = math.exp %291 : vector<8x128xf32>
    %cst_49 = arith.constant 1.000000e+00 : f32
    %293 = vector.broadcast %cst_49 : f32 to vector<8x128xf32>
    %294 = arith.addf %293, %292 : vector<8x128xf32>
    %295 = arith.divf %293, %294 : vector<8x128xf32>
    %296 = math.tanh %290 : vector<8x128xf32>
    %297 = vector.extract_strided_slice %295 {offsets = [0, 0], sizes = [8, 32], strides = [1, 1]} : vector<8x128xf32> to vector<8x32xf32>
    %298 = vector.extract_strided_slice %295 {offsets = [0, 32], sizes = [8, 32], strides = [1, 1]} : vector<8x128xf32> to vector<8x32xf32>
    %299 = vector.extract_strided_slice %296 {offsets = [0, 64], sizes = [8, 32], strides = [1, 1]} : vector<8x128xf32> to vector<8x32xf32>
    %300 = vector.extract_strided_slice %295 {offsets = [0, 96], sizes = [8, 32], strides = [1, 1]} : vector<8x128xf32> to vector<8x32xf32>
    %301 = arith.mulf %298, %285 : vector<8x32xf32>
    %302 = arith.mulf %297, %299 : vector<8x32xf32>
    %303 = arith.addf %301, %302 : vector<8x32xf32>
    %304 = math.tanh %303 : vector<8x32xf32>
    %305 = arith.mulf %300, %304 : vector<8x32xf32>
    %306 = tpu.concatenate %179, %197, %215, %233, %251, %269, %287, %305 in 0 : vector<8x32xf32>, vector<8x32xf32>, vector<8x32xf32>, vector<8x32xf32>, vector<8x32xf32>, vector<8x32xf32>, vector<8x32xf32>, vector<8x32xf32> -> vector<64x32xf32>
    %c0_50 = arith.constant 0 : index
    %c0_51 = arith.constant 0 : index
    %307 = vector.load %arg7[%c0_50, %c0_51] : memref<32x128xf32, #tpu.memory_space<vmem>>, vector<32x128xf32>
    %cst_52 = arith.constant dense<0.000000e+00> : vector<64x128xf32>
    %308 = tpu.matmul %306, %307, %cst_52 {dimension_numbers = #tpu.dot_dimension_numbers<[1], [0], [0], [1], [0, 0, 1, 1], [], []>} : vector<64x32xf32>, vector<32x128xf32>, vector<64x128xf32> -> vector<64x128xf32>
    %c0_53 = arith.constant 0 : index
    %c0_54 = arith.constant 0 : index
    %309 = vector.load %arg9[%c0_53, %c0_54] : memref<1x128xf32, #tpu.memory_space<vmem>>, vector<1x128xf32>
    %310 = vector.broadcast %309 : vector<1x128xf32> to vector<64x128xf32>
    %311 = arith.addf %308, %310 : vector<64x128xf32>
    %c0_55 = arith.constant 0 : index
    %c0_56 = arith.constant 0 : index
    %312 = vector.load %arg8[%c0_55, %c0_56] : memref<32x128xf32, #tpu.memory_space<vmem>>, vector<32x128xf32>
    %cst_57 = arith.constant 0.000000e+00 : f32
    %313 = vector.broadcast %cst_57 : f32 to vector<8x32xf32>
    %cst_58 = arith.constant 0.000000e+00 : f32
    %314 = vector.broadcast %cst_58 : f32 to vector<8x32xf32>
    %315 = vector.extract_strided_slice %311 {offsets = [0, 0], sizes = [8, 128], strides = [1, 1]} : vector<64x128xf32> to vector<8x128xf32>
    %cst_59 = arith.constant dense<0.000000e+00> : vector<8x128xf32>
    %316 = tpu.matmul %313, %312, %cst_59 {dimension_numbers = #tpu.dot_dimension_numbers<[1], [0], [0], [1], [0, 0, 1, 1], [], []>} : vector<8x32xf32>, vector<32x128xf32>, vector<8x128xf32> -> vector<8x128xf32>
    %317 = arith.addf %315, %316 : vector<8x128xf32>
    %318 = arith.negf %317 : vector<8x128xf32>
    %319 = math.exp %318 : vector<8x128xf32>
    %cst_60 = arith.constant 1.000000e+00 : f32
    %320 = vector.broadcast %cst_60 : f32 to vector<8x128xf32>
    %321 = arith.addf %320, %319 : vector<8x128xf32>
    %322 = arith.divf %320, %321 : vector<8x128xf32>
    %323 = math.tanh %317 : vector<8x128xf32>
    %324 = vector.extract_strided_slice %322 {offsets = [0, 0], sizes = [8, 32], strides = [1, 1]} : vector<8x128xf32> to vector<8x32xf32>
    %325 = vector.extract_strided_slice %322 {offsets = [0, 32], sizes = [8, 32], strides = [1, 1]} : vector<8x128xf32> to vector<8x32xf32>
    %326 = vector.extract_strided_slice %323 {offsets = [0, 64], sizes = [8, 32], strides = [1, 1]} : vector<8x128xf32> to vector<8x32xf32>
    %327 = vector.extract_strided_slice %322 {offsets = [0, 96], sizes = [8, 32], strides = [1, 1]} : vector<8x128xf32> to vector<8x32xf32>
    %328 = arith.mulf %325, %314 : vector<8x32xf32>
    %329 = arith.mulf %324, %326 : vector<8x32xf32>
    %330 = arith.addf %328, %329 : vector<8x32xf32>
    %331 = math.tanh %330 : vector<8x32xf32>
    %332 = arith.mulf %327, %331 : vector<8x32xf32>
    %333 = vector.extract_strided_slice %311 {offsets = [8, 0], sizes = [8, 128], strides = [1, 1]} : vector<64x128xf32> to vector<8x128xf32>
    %cst_61 = arith.constant dense<0.000000e+00> : vector<8x128xf32>
    %334 = tpu.matmul %332, %312, %cst_61 {dimension_numbers = #tpu.dot_dimension_numbers<[1], [0], [0], [1], [0, 0, 1, 1], [], []>} : vector<8x32xf32>, vector<32x128xf32>, vector<8x128xf32> -> vector<8x128xf32>
    %335 = arith.addf %333, %334 : vector<8x128xf32>
    %336 = arith.negf %335 : vector<8x128xf32>
    %337 = math.exp %336 : vector<8x128xf32>
    %cst_62 = arith.constant 1.000000e+00 : f32
    %338 = vector.broadcast %cst_62 : f32 to vector<8x128xf32>
    %339 = arith.addf %338, %337 : vector<8x128xf32>
    %340 = arith.divf %338, %339 : vector<8x128xf32>
    %341 = math.tanh %335 : vector<8x128xf32>
    %342 = vector.extract_strided_slice %340 {offsets = [0, 0], sizes = [8, 32], strides = [1, 1]} : vector<8x128xf32> to vector<8x32xf32>
    %343 = vector.extract_strided_slice %340 {offsets = [0, 32], sizes = [8, 32], strides = [1, 1]} : vector<8x128xf32> to vector<8x32xf32>
    %344 = vector.extract_strided_slice %341 {offsets = [0, 64], sizes = [8, 32], strides = [1, 1]} : vector<8x128xf32> to vector<8x32xf32>
    %345 = vector.extract_strided_slice %340 {offsets = [0, 96], sizes = [8, 32], strides = [1, 1]} : vector<8x128xf32> to vector<8x32xf32>
    %346 = arith.mulf %343, %330 : vector<8x32xf32>
    %347 = arith.mulf %342, %344 : vector<8x32xf32>
    %348 = arith.addf %346, %347 : vector<8x32xf32>
    %349 = math.tanh %348 : vector<8x32xf32>
    %350 = arith.mulf %345, %349 : vector<8x32xf32>
    %351 = vector.extract_strided_slice %311 {offsets = [16, 0], sizes = [8, 128], strides = [1, 1]} : vector<64x128xf32> to vector<8x128xf32>
    %cst_63 = arith.constant dense<0.000000e+00> : vector<8x128xf32>
    %352 = tpu.matmul %350, %312, %cst_63 {dimension_numbers = #tpu.dot_dimension_numbers<[1], [0], [0], [1], [0, 0, 1, 1], [], []>} : vector<8x32xf32>, vector<32x128xf32>, vector<8x128xf32> -> vector<8x128xf32>
    %353 = arith.addf %351, %352 : vector<8x128xf32>
    %354 = arith.negf %353 : vector<8x128xf32>
    %355 = math.exp %354 : vector<8x128xf32>
    %cst_64 = arith.constant 1.000000e+00 : f32
    %356 = vector.broadcast %cst_64 : f32 to vector<8x128xf32>
    %357 = arith.addf %356, %355 : vector<8x128xf32>
    %358 = arith.divf %356, %357 : vector<8x128xf32>
    %359 = math.tanh %353 : vector<8x128xf32>
    %360 = vector.extract_strided_slice %358 {offsets = [0, 0], sizes = [8, 32], strides = [1, 1]} : vector<8x128xf32> to vector<8x32xf32>
    %361 = vector.extract_strided_slice %358 {offsets = [0, 32], sizes = [8, 32], strides = [1, 1]} : vector<8x128xf32> to vector<8x32xf32>
    %362 = vector.extract_strided_slice %359 {offsets = [0, 64], sizes = [8, 32], strides = [1, 1]} : vector<8x128xf32> to vector<8x32xf32>
    %363 = vector.extract_strided_slice %358 {offsets = [0, 96], sizes = [8, 32], strides = [1, 1]} : vector<8x128xf32> to vector<8x32xf32>
    %364 = arith.mulf %361, %348 : vector<8x32xf32>
    %365 = arith.mulf %360, %362 : vector<8x32xf32>
    %366 = arith.addf %364, %365 : vector<8x32xf32>
    %367 = math.tanh %366 : vector<8x32xf32>
    %368 = arith.mulf %363, %367 : vector<8x32xf32>
    %369 = vector.extract_strided_slice %311 {offsets = [24, 0], sizes = [8, 128], strides = [1, 1]} : vector<64x128xf32> to vector<8x128xf32>
    %cst_65 = arith.constant dense<0.000000e+00> : vector<8x128xf32>
    %370 = tpu.matmul %368, %312, %cst_65 {dimension_numbers = #tpu.dot_dimension_numbers<[1], [0], [0], [1], [0, 0, 1, 1], [], []>} : vector<8x32xf32>, vector<32x128xf32>, vector<8x128xf32> -> vector<8x128xf32>
    %371 = arith.addf %369, %370 : vector<8x128xf32>
    %372 = arith.negf %371 : vector<8x128xf32>
    %373 = math.exp %372 : vector<8x128xf32>
    %cst_66 = arith.constant 1.000000e+00 : f32
    %374 = vector.broadcast %cst_66 : f32 to vector<8x128xf32>
    %375 = arith.addf %374, %373 : vector<8x128xf32>
    %376 = arith.divf %374, %375 : vector<8x128xf32>
    %377 = math.tanh %371 : vector<8x128xf32>
    %378 = vector.extract_strided_slice %376 {offsets = [0, 0], sizes = [8, 32], strides = [1, 1]} : vector<8x128xf32> to vector<8x32xf32>
    %379 = vector.extract_strided_slice %376 {offsets = [0, 32], sizes = [8, 32], strides = [1, 1]} : vector<8x128xf32> to vector<8x32xf32>
    %380 = vector.extract_strided_slice %377 {offsets = [0, 64], sizes = [8, 32], strides = [1, 1]} : vector<8x128xf32> to vector<8x32xf32>
    %381 = vector.extract_strided_slice %376 {offsets = [0, 96], sizes = [8, 32], strides = [1, 1]} : vector<8x128xf32> to vector<8x32xf32>
    %382 = arith.mulf %379, %366 : vector<8x32xf32>
    %383 = arith.mulf %378, %380 : vector<8x32xf32>
    %384 = arith.addf %382, %383 : vector<8x32xf32>
    %385 = math.tanh %384 : vector<8x32xf32>
    %386 = arith.mulf %381, %385 : vector<8x32xf32>
    %387 = vector.extract_strided_slice %311 {offsets = [32, 0], sizes = [8, 128], strides = [1, 1]} : vector<64x128xf32> to vector<8x128xf32>
    %cst_67 = arith.constant dense<0.000000e+00> : vector<8x128xf32>
    %388 = tpu.matmul %386, %312, %cst_67 {dimension_numbers = #tpu.dot_dimension_numbers<[1], [0], [0], [1], [0, 0, 1, 1], [], []>} : vector<8x32xf32>, vector<32x128xf32>, vector<8x128xf32> -> vector<8x128xf32>
    %389 = arith.addf %387, %388 : vector<8x128xf32>
    %390 = arith.negf %389 : vector<8x128xf32>
    %391 = math.exp %390 : vector<8x128xf32>
    %cst_68 = arith.constant 1.000000e+00 : f32
    %392 = vector.broadcast %cst_68 : f32 to vector<8x128xf32>
    %393 = arith.addf %392, %391 : vector<8x128xf32>
    %394 = arith.divf %392, %393 : vector<8x128xf32>
    %395 = math.tanh %389 : vector<8x128xf32>
    %396 = vector.extract_strided_slice %394 {offsets = [0, 0], sizes = [8, 32], strides = [1, 1]} : vector<8x128xf32> to vector<8x32xf32>
    %397 = vector.extract_strided_slice %394 {offsets = [0, 32], sizes = [8, 32], strides = [1, 1]} : vector<8x128xf32> to vector<8x32xf32>
    %398 = vector.extract_strided_slice %395 {offsets = [0, 64], sizes = [8, 32], strides = [1, 1]} : vector<8x128xf32> to vector<8x32xf32>
    %399 = vector.extract_strided_slice %394 {offsets = [0, 96], sizes = [8, 32], strides = [1, 1]} : vector<8x128xf32> to vector<8x32xf32>
    %400 = arith.mulf %397, %384 : vector<8x32xf32>
    %401 = arith.mulf %396, %398 : vector<8x32xf32>
    %402 = arith.addf %400, %401 : vector<8x32xf32>
    %403 = math.tanh %402 : vector<8x32xf32>
    %404 = arith.mulf %399, %403 : vector<8x32xf32>
    %405 = vector.extract_strided_slice %311 {offsets = [40, 0], sizes = [8, 128], strides = [1, 1]} : vector<64x128xf32> to vector<8x128xf32>
    %cst_69 = arith.constant dense<0.000000e+00> : vector<8x128xf32>
    %406 = tpu.matmul %404, %312, %cst_69 {dimension_numbers = #tpu.dot_dimension_numbers<[1], [0], [0], [1], [0, 0, 1, 1], [], []>} : vector<8x32xf32>, vector<32x128xf32>, vector<8x128xf32> -> vector<8x128xf32>
    %407 = arith.addf %405, %406 : vector<8x128xf32>
    %408 = arith.negf %407 : vector<8x128xf32>
    %409 = math.exp %408 : vector<8x128xf32>
    %cst_70 = arith.constant 1.000000e+00 : f32
    %410 = vector.broadcast %cst_70 : f32 to vector<8x128xf32>
    %411 = arith.addf %410, %409 : vector<8x128xf32>
    %412 = arith.divf %410, %411 : vector<8x128xf32>
    %413 = math.tanh %407 : vector<8x128xf32>
    %414 = vector.extract_strided_slice %412 {offsets = [0, 0], sizes = [8, 32], strides = [1, 1]} : vector<8x128xf32> to vector<8x32xf32>
    %415 = vector.extract_strided_slice %412 {offsets = [0, 32], sizes = [8, 32], strides = [1, 1]} : vector<8x128xf32> to vector<8x32xf32>
    %416 = vector.extract_strided_slice %413 {offsets = [0, 64], sizes = [8, 32], strides = [1, 1]} : vector<8x128xf32> to vector<8x32xf32>
    %417 = vector.extract_strided_slice %412 {offsets = [0, 96], sizes = [8, 32], strides = [1, 1]} : vector<8x128xf32> to vector<8x32xf32>
    %418 = arith.mulf %415, %402 : vector<8x32xf32>
    %419 = arith.mulf %414, %416 : vector<8x32xf32>
    %420 = arith.addf %418, %419 : vector<8x32xf32>
    %421 = math.tanh %420 : vector<8x32xf32>
    %422 = arith.mulf %417, %421 : vector<8x32xf32>
    %423 = vector.extract_strided_slice %311 {offsets = [48, 0], sizes = [8, 128], strides = [1, 1]} : vector<64x128xf32> to vector<8x128xf32>
    %cst_71 = arith.constant dense<0.000000e+00> : vector<8x128xf32>
    %424 = tpu.matmul %422, %312, %cst_71 {dimension_numbers = #tpu.dot_dimension_numbers<[1], [0], [0], [1], [0, 0, 1, 1], [], []>} : vector<8x32xf32>, vector<32x128xf32>, vector<8x128xf32> -> vector<8x128xf32>
    %425 = arith.addf %423, %424 : vector<8x128xf32>
    %426 = arith.negf %425 : vector<8x128xf32>
    %427 = math.exp %426 : vector<8x128xf32>
    %cst_72 = arith.constant 1.000000e+00 : f32
    %428 = vector.broadcast %cst_72 : f32 to vector<8x128xf32>
    %429 = arith.addf %428, %427 : vector<8x128xf32>
    %430 = arith.divf %428, %429 : vector<8x128xf32>
    %431 = math.tanh %425 : vector<8x128xf32>
    %432 = vector.extract_strided_slice %430 {offsets = [0, 0], sizes = [8, 32], strides = [1, 1]} : vector<8x128xf32> to vector<8x32xf32>
    %433 = vector.extract_strided_slice %430 {offsets = [0, 32], sizes = [8, 32], strides = [1, 1]} : vector<8x128xf32> to vector<8x32xf32>
    %434 = vector.extract_strided_slice %431 {offsets = [0, 64], sizes = [8, 32], strides = [1, 1]} : vector<8x128xf32> to vector<8x32xf32>
    %435 = vector.extract_strided_slice %430 {offsets = [0, 96], sizes = [8, 32], strides = [1, 1]} : vector<8x128xf32> to vector<8x32xf32>
    %436 = arith.mulf %433, %420 : vector<8x32xf32>
    %437 = arith.mulf %432, %434 : vector<8x32xf32>
    %438 = arith.addf %436, %437 : vector<8x32xf32>
    %439 = math.tanh %438 : vector<8x32xf32>
    %440 = arith.mulf %435, %439 : vector<8x32xf32>
    %441 = vector.extract_strided_slice %311 {offsets = [56, 0], sizes = [8, 128], strides = [1, 1]} : vector<64x128xf32> to vector<8x128xf32>
    %cst_73 = arith.constant dense<0.000000e+00> : vector<8x128xf32>
    %442 = tpu.matmul %440, %312, %cst_73 {dimension_numbers = #tpu.dot_dimension_numbers<[1], [0], [0], [1], [0, 0, 1, 1], [], []>} : vector<8x32xf32>, vector<32x128xf32>, vector<8x128xf32> -> vector<8x128xf32>
    %443 = arith.addf %441, %442 : vector<8x128xf32>
    %444 = arith.negf %443 : vector<8x128xf32>
    %445 = math.exp %444 : vector<8x128xf32>
    %cst_74 = arith.constant 1.000000e+00 : f32
    %446 = vector.broadcast %cst_74 : f32 to vector<8x128xf32>
    %447 = arith.addf %446, %445 : vector<8x128xf32>
    %448 = arith.divf %446, %447 : vector<8x128xf32>
    %449 = math.tanh %443 : vector<8x128xf32>
    %450 = vector.extract_strided_slice %448 {offsets = [0, 0], sizes = [8, 32], strides = [1, 1]} : vector<8x128xf32> to vector<8x32xf32>
    %451 = vector.extract_strided_slice %448 {offsets = [0, 32], sizes = [8, 32], strides = [1, 1]} : vector<8x128xf32> to vector<8x32xf32>
    %452 = vector.extract_strided_slice %449 {offsets = [0, 64], sizes = [8, 32], strides = [1, 1]} : vector<8x128xf32> to vector<8x32xf32>
    %453 = vector.extract_strided_slice %448 {offsets = [0, 96], sizes = [8, 32], strides = [1, 1]} : vector<8x128xf32> to vector<8x32xf32>
    %454 = arith.mulf %451, %438 : vector<8x32xf32>
    %455 = arith.mulf %450, %452 : vector<8x32xf32>
    %456 = arith.addf %454, %455 : vector<8x32xf32>
    %457 = math.tanh %456 : vector<8x32xf32>
    %458 = arith.mulf %453, %457 : vector<8x32xf32>
    %c0_75 = arith.constant 0 : index
    %c0_76 = arith.constant 0 : index
    %459 = vector.load %arg10[%c0_75, %c0_76] : memref<32x32xf32, #tpu.memory_space<vmem>>, vector<32x32xf32>
    %cst_77 = arith.constant dense<0.000000e+00> : vector<8x32xf32>
    %460 = tpu.matmul %458, %459, %cst_77 {dimension_numbers = #tpu.dot_dimension_numbers<[1], [0], [0], [1], [0, 0, 1, 1], [], []>} : vector<8x32xf32>, vector<32x32xf32>, vector<8x32xf32> -> vector<8x32xf32>
    %c0_78 = arith.constant 0 : index
    %c0_79 = arith.constant 0 : index
    %461 = vector.load %arg11[%c0_78, %c0_79] : memref<1x32xf32, #tpu.memory_space<vmem>>, vector<1x32xf32>
    %462 = vector.broadcast %461 : vector<1x32xf32> to vector<8x32xf32>
    %463 = arith.addf %460, %462 : vector<8x32xf32>
    %cst_80 = arith.constant 0.000000e+00 : f32
    %464 = vector.broadcast %cst_80 : f32 to vector<8x32xf32>
    %465 = arith.maximumf %463, %464 : vector<8x32xf32>
    %c0_81 = arith.constant 0 : index
    %c0_82 = arith.constant 0 : index
    %466 = vector.load %arg12[%c0_81, %c0_82] : memref<32x48xf32, #tpu.memory_space<vmem>>, vector<32x48xf32>
    %cst_83 = arith.constant dense<0.000000e+00> : vector<8x48xf32>
    %467 = tpu.matmul %465, %466, %cst_83 {dimension_numbers = #tpu.dot_dimension_numbers<[1], [0], [0], [1], [0, 0, 1, 1], [], []>} : vector<8x32xf32>, vector<32x48xf32>, vector<8x48xf32> -> vector<8x48xf32>
    %c0_84 = arith.constant 0 : index
    %c0_85 = arith.constant 0 : index
    %468 = vector.load %arg13[%c0_84, %c0_85] : memref<1x48xf32, #tpu.memory_space<vmem>>, vector<1x48xf32>
    %469 = vector.broadcast %468 : vector<1x48xf32> to vector<8x48xf32>
    %470 = arith.addf %467, %469 : vector<8x48xf32>
    %cst_86 = arith.constant 0.000000e+00 : f32
    %471 = vector.broadcast %cst_86 : f32 to vector<8x48xf32>
    %472 = arith.maximumf %470, %471 : vector<8x48xf32>
    %c0_87 = arith.constant 0 : index
    %c0_88 = arith.constant 0 : index
    %473 = vector.load %arg14[%c0_87, %c0_88] : memref<48x128xf32, #tpu.memory_space<vmem>>, vector<48x128xf32>
    %cst_89 = arith.constant dense<0.000000e+00> : vector<8x128xf32>
    %474 = tpu.matmul %472, %473, %cst_89 {dimension_numbers = #tpu.dot_dimension_numbers<[1], [0], [0], [1], [0, 0, 1, 1], [], []>} : vector<8x48xf32>, vector<48x128xf32>, vector<8x128xf32> -> vector<8x128xf32>
    %c0_90 = arith.constant 0 : index
    %c0_91 = arith.constant 0 : index
    %475 = vector.load %arg15[%c0_90, %c0_91] : memref<1x128xf32, #tpu.memory_space<vmem>>, vector<1x128xf32>
    %476 = vector.broadcast %475 : vector<1x128xf32> to vector<8x128xf32>
    %477 = arith.addf %474, %476 : vector<8x128xf32>
    %478 = tpu.iota {dimensions = array<i32: 1>} : vector<8x128xi32>
    %c2_i32 = arith.constant 2 : i32
    %479 = vector.broadcast %c2_i32 : i32 to vector<8x128xi32>
    %480 = arith.cmpi slt, %478, %479 : vector<8x128xi32>
    %cst_92 = arith.constant 0.000000e+00 : f32
    %481 = vector.broadcast %cst_92 : f32 to vector<8x128xf32>
    %482 = arith.maximumf %477, %481 : vector<8x128xf32>
    %483 = arith.select %480, %482, %477 : vector<8x128xi1>, vector<8x128xf32>
    %c0_93 = arith.constant 0 : index
    %c0_94 = arith.constant 0 : index
    %484 = vector.load %arg16[%c0_93, %c0_94] : memref<8x128xf32, #tpu.memory_space<vmem>>, vector<8x128xf32>
    tpu.vector_store %arg16[%c0_93, %c0_94], %483 {strides = array<i32>} : memref<8x128xf32, #tpu.memory_space<vmem>>, vector<8x128xf32>,
    return
  }
}

</mosaic_0001>

<bundles_post_ra>
// kernel: three_layer_lstm_forward.1
= control target key start
LH: loop header
LB: loop body
LE: loop exit
PB: predicated region body
PF: predicated region fallthrough
CT: control target
= control target key end

     0   :  { %vm69_vm0 = vcmask 261120   ;;  %v2139_v16 = vmov 0.0   ;;  %s2747_s1 = inlined_call_operand.vmem [shape: f32[32,128], index: 1, kind: input, shape index: {}]   ;;  %s2748_s2 = inlined_call_operand.vmem [shape: f32[32,128], index: 2, kind: input, shape index: {}]   ;;  %s2749_s0 = inlined_call_operand.vmem [shape: f32[64,32], index: 0, kind: input, shape index: {}]   ;;  %s2750_s3 = inlined_call_operand.vmem [shape: f32[1,128], index: 3, kind: input, shape index: {}]   ;;  %s2751_s4 = inlined_call_operand.vmem [shape: f32[32,128], index: 4, kind: input, shape index: {}]   ;;  %s2752_s6 = inlined_call_operand.vmem [shape: f32[1,128], index: 6, kind: input, shape index: {}]   ;;  %s2753_s5 = inlined_call_operand.vmem [shape: f32[32,128], index: 5, kind: input, shape index: {}]   ;;  %s2754_s7 = inlined_call_operand.vmem [shape: f32[32,128], index: 7, kind: input, shape index: {}]   ;;  %s2755_s9 = inlined_call_operand.vmem [shape: f32[1,128], index: 9, kind: input, shape index: {}]   ;;  %s2756_s8 = inlined_call_operand.vmem [shape: f32[32,128], index: 8, kind: input, shape index: {}]   ;;  %s2757_s11 = inlined_call_operand.vmem [shape: f32[1,32], index: 11, kind: input, shape index: {}]   ;;  %s2758_s10 = inlined_call_operand.vmem [shape: f32[32,32], index: 10, kind: input, shape index: {}]   ;;  %s2759_s12 = inlined_call_operand.vmem [shape: f32[32,48], index: 12, kind: input, shape index: {}]   ;;  %s2760_s13 = inlined_call_operand.vmem [shape: f32[1,48], index: 13, kind: input, shape index: {}]   ;;  %s2761_s14 = inlined_call_operand.vmem [shape: f32[48,128], index: 14, kind: input, shape index: {}]   ;;  %s2762_s15 = inlined_call_operand.vmem [shape: f32[1,128], index: 15, kind: input, shape index: {}]   ;;  %s2763_s16 = inlined_call_operand.vmem [shape: f32[8,128], index: 16, kind: output, shape index: {}]  }
   0x1   :  { %2765 = sst [smem:[#allocation2_spill]] %s2747_s1  ;;  %v2236_v2 = vld [vmem:[%s2748_s2 + $0x18] sm:$0xff]  ;;  %v2246_v4 = vld [vmem:[%s2748_s2 + $0x10] sm:$0xff]  ;;  %v53_v6 = vld [vmem:[%s2749_s0] sm:$0xff] }
   0x2   :  { %s2766_s23 = sld [smem:[#allocation2_spill]]  ;;  %217 = vmatpush.msra.mxu2 %v2236_v2  ;;  %280 = vmatpush.msra.mxu3 %v2236_v2  ;;  %v2262_v7 = vld [vmem:[%s2748_s2 + $0x8] sm:$0xff]  ;;  %v55_v9 = vld [vmem:[%s2749_s0 + $0x10] sm:$0xff]  ;;  %v2281_v10 = vld [vmem:[%s2748_s2] sm:$0xff] }
   0x3   :  { %532 = vmatpush.msra.mxu1 %v2236_v2  ;;  %v54_v8 = vld [vmem:[%s2749_s0 + $0x8] sm:$0xff]  ;;  %v56_v11 = vld [vmem:[%s2749_s0 + $0x18] sm:$0xff]  ;;  %v57_v12 = vld [vmem:[%s2749_s0 + $0x20] sm:$0xff] }
   0x4   :  { %218 = vmatpush.msra.mxu2 %v2246_v4  ;;  %281 = vmatpush.msra.mxu3 %v2246_v4  ;;  %v58_v13 = vld [vmem:[%s2749_s0 + $0x28] sm:$0xff]  ;;  %v59_v14 = vld [vmem:[%s2749_s0 + $0x30] sm:$0xff]  ;;  %v60_v15 = vld [vmem:[%s2749_s0 + $0x38] sm:$0xff]  ;;  %s2140_s0 = smov 64  }
   0x5   :  { %533 = vmatpush.msra.mxu1 %v2246_v4  ;;  %v1940_v18 = vld [vmem:[%s2750_s3] ss:$0 sm:$0xff]  ;;  %s2141_s3 = smov 32  }
   0x6   :  { %219 = vmatpush.msra.mxu2 %v2262_v7  ;;  %282 = vmatpush.msra.mxu3 %v2262_v7 }
   0x7   :  { %534 = vmatpush.msra.mxu1 %v2262_v7 }
   0x8   :  { %v64_v0 = vld [vmem:[%s2766_s23 + $0x18] sm:$0xff]  ;;  %v63_v1 = vld [vmem:[%s2766_s23 + $0x10] sm:$0xff]  ;;  %v62_v3 = vld [vmem:[%s2766_s23 + $0x8] sm:$0xff]  ;;  %220 = vmatpush.msra.mxu2 %v2281_v10  ;;  %283 = vmatpush.msra.mxu3 %v2281_v10 }
   0x9   :  { %106 = vmatpush.msra.mxu0 %v64_v0  ;;  %v61_v5 = vld [vmem:[%s2766_s23] sm:$0xff]  ;;  %535 = vmatpush.msra.mxu1 %v2281_v10 }
   0xa   :  { %343 = vmatpush.msrb.mxu2 %v2236_v2  ;;  %469 = vmatpush.msrb.mxu3 %v2236_v2 }
   0xb   :  { %107 = vmatpush.msra.mxu0 %v63_v1 }
   0xc   :  { %344 = vmatpush.msrb.mxu2 %v2246_v4  ;;  %470 = vmatpush.msrb.mxu3 %v2246_v4 }
   0xd   :  { %108 = vmatpush.msra.mxu0 %v62_v3 }
   0xe   :  { %345 = vmatpush.msrb.mxu2 %v2262_v7  ;;  %471 = vmatpush.msrb.mxu3 %v2262_v7 }
   0xf   :  { %109 = vmatpush.msra.mxu0 %v61_v5 }
  0x10   :  { %1865 = vmatmul.msk.f32.vlgmr.msra.gmra.mxu0 %vm69_vm0, %v53_v6  ;;  %346 = vmatpush.msrb.mxu2 %v2281_v10 }
  0x11   :  { %154 = vmatpush.msrb.mxu0 %v2236_v2  ;;  %472 = vmatpush.msrb.mxu3 %v2281_v10 }
  0x13   :  { %155 = vmatpush.msrb.mxu0 %v2246_v4 }
  0x15   :  { %156 = vmatpush.msrb.mxu0 %v2262_v7 }
  0x17   :  { %157 = vmatpush.msrb.mxu0 %v2281_v10 }
  0x18   :  { %1866 = vmatmul.msk.f32.gmra.mxu0 %vm69_vm0, %v54_v8 }
  0x20   :  { %1867 = vmatmul.msk.f32.gmra.mxu0 %vm69_vm0, %v55_v9 }
  0x28   :  { %1868 = vmatmul.msk.f32.gmra.mxu0 %vm69_vm0, %v56_v11 }
  0x30   :  { %1869 = vmatmul.msk.f32.gmra.mxu0 %vm69_vm0, %v57_v12 }
  0x38   :  { %1870 = vmatmul.msk.f32.gmra.mxu0 %vm69_vm0, %v58_v13 }
  0x40   :  { %1871 = vmatmul.msk.f32.gmra.mxu0 %vm69_vm0, %v59_v14 }
  0x48   :  { %1872 = vmatmul.msk.f32.gmra.mxu0 %vm69_vm0, %v60_v15 }
  0x50   :  { %158 = vmatmul.f32.vlgmr.msrb.gmra.mxu0 %v2139_v16 }
  0x8d   :  { %v111_v17 = vpop.f32.mrf.mxu0 }
  0x8e   :  { %v112_v33 = vadd.f32 %v1940_v18, %v111_v17 }
  0x95   :  { %v114_v19 = vpop.f32.mrf.mxu0 }
  0x96   :  { %v115_v20 = vadd.f32 %v1940_v18, %v114_v19 }
  0x9d   :  { %v117_v21 = vpop.f32.mrf.mxu0 }
  0x9e   :  { %v2319_v22 = vadd.f32 %v1940_v18, %v117_v21 }
  0xa5   :  { %v120_v23 = vpop.f32.mrf.mxu0 }
  0xa6   :  { %v2321_v24 = vadd.f32 %v1940_v18, %v120_v23 }
  0xad   :  { %v123_v25 = vpop.f32.mrf.mxu0 }
  0xae   :  { %v2323_v26 = vadd.f32 %v1940_v18, %v123_v25 }
  0xb5   :  { %v126_v27 = vpop.f32.mrf.mxu0 }
  0xb6   :  { %v2325_v28 = vadd.f32 %v1940_v18, %v126_v27 }
  0xbd   :  { %v129_v29 = vpop.f32.mrf.mxu0 }
  0xbe   :  { %v2327_v30 = vadd.f32 %v1940_v18, %v129_v29 }
  0xc5   :  { %v132_v31 = vpop.f32.mrf.mxu0 }
  0xc6   :  { %v2329_v32 = vadd.f32 %v1940_v18, %v132_v31 }
  0xcd   :  { %v159_v34 = vpop.f32.mrf.mxu0 }
  0xce   :  { %v162_v35 = vadd.f32 %v159_v34, %v112_v33 }
  0xd0   :  { %1946 = vtanh.f32 %v162_v35  ;;  %v1873_v37 = vmul.f32 -1.442695, %v162_v35 }
  0xd2   :  { %1948 = vpow2.f32 %v1873_v37 }
  0xd6   :  { %v1947_v36 = vpop.eup %1946 }
  0xd7   :  { %185 = vrot.lane.b32.xlu0 %v1947_v36, %s2140_s0 }
  0xd8   :  { %v1949_v38 = vpop.eup %1948 }
  0xd9   :  { %v166_v39 = vadd.f32 1.0, %v1949_v38 }
  0xdb   :  { %1950 = vrcp.f32 %v166_v39  ;;  %v178_v45 = vand.u32 2147483648, %v166_v39  ;;  %vm172_vm2 = vweird.f32 %v166_v39  ;;  %v176_v46 = vand.u32 2147483647, %v166_v39 }
  0xdd   :  { %v179_v48 = vor.u32 1.1754944e-38, %v178_v45  ;;  %vm177_vm4 = vcmp.eq.f32.partialorder %v176_v46, 8.507059e+37 }
  0xe1   :  { %v1951_v40 = vpop.eup %1950 }
  0xe2   :  { %v168_v41 = vmul.f32 %v1951_v40, %v166_v39  ;;  %vm173_vm1 = vweird.f32 %v1951_v40 }
  0xe3   :  { %vm174_vm3 = vmor %vm172_vm2, %vm173_vm1 }
  0xe4   :  { %v169_v42 = vsub.f32 1.0, %v168_v41 }
  0xe6   :  { %v170_v43 = vmul.f32 %v1951_v40, %v169_v42 }
  0xe8   :  { %v171_v44 = vadd.f32 %v1951_v40, %v170_v43 }
  0xea   :  { %v175_v47 = vsel %vm174_vm3, %v1951_v40, %v171_v44 }
  0xeb   :  { %v180_v50 = vsel %vm177_vm4, %v179_v48, %v175_v47 }
  0xec   :  { %v183_v52 = vmul.f32 0.0, %v180_v50 }
 0x149   :  { %v186_v49 = vpop.permute.xlu0 %185 }
 0x14a   :  { %v188_v51 = vmul.f32 %v186_v49, %v180_v50 }
 0x14c   :  { %190 = vrot.lane.b32.xlu0 %v188_v51, %s2141_s3 }
 0x1be   :  { %v191_v53 = vpop.permute.xlu0 %190 }
 0x1bf   :  { %v193_v54 = vadd.f32 %v191_v53, %v183_v52 }
 0x1c1   :  { %1952 = vtanh.f32 %v193_v54 }
 0x1c7   :  { %v1953_v55 = vpop.eup %1952 }
 0x1c8   :  { %196 = vrot.lane.b32.xlu1 %v1953_v55, %s2140_s0 }
 0x23a   :  { %v197_v56 = vpop.permute.xlu1 %196 }
 0x23b   :  { %v199_v57 = vmul.f32 %v197_v56, %v180_v50 }
 0x23d   :  { %201 = vrot.lane.b32.xlu1 %v199_v57, %s2141_s3 }
 0x2af   :  { %v2335_v58 = vpop.permute.xlu1 %201 }
 0x2b0   :  { %1874 = vmatmul.msk.f32.vlgmr.msra.gmra.mxu2 %vm69_vm0, %v2335_v58 }
 0x2b1   :  { %406 = vmatpush.msra.mxu2 %v2236_v2 }
 0x2b3   :  { %407 = vmatpush.msra.mxu2 %v2246_v4 }
 0x2b5   :  { %408 = vmatpush.msra.mxu2 %v2262_v7 }
 0x2b7   :  { %409 = vmatpush.msra.mxu2 %v2281_v10 }
 0x333   :  { %v222_v59 = vpop.f32.mrf.mxu2 }
 0x334   :  { %v225_v60 = vadd.f32 %v222_v59, %v115_v20 }
 0x336   :  { %1954 = vtanh.f32 %v225_v60  ;;  %v1875_v62 = vmul.f32 -1.442695, %v225_v60 }
 0x338   :  { %1956 = vpow2.f32 %v1875_v62 }
 0x33c   :  { %v1955_v61 = vpop.eup %1954 }
 0x33d   :  { %248 = vrot.lane.b32.xlu2 %v1955_v61, %s2140_s0 }
 0x33e   :  { %v1957_v63 = vpop.eup %1956 }
 0x33f   :  { %v229_v0 = vadd.f32 1.0, %v1957_v63 }
 0x341   :  { %1958 = vrcp.f32 %v229_v0  ;;  %v241_v9 = vand.u32 2147483648, %v229_v0  ;;  %vm235_vm6 = vweird.f32 %v229_v0  ;;  %v239_v11 = vand.u32 2147483647, %v229_v0 }
 0x343   :  { %v242_v13 = vor.u32 1.1754944e-38, %v241_v9  ;;  %vm240_vm8 = vcmp.eq.f32.partialorder %v239_v11, 8.507059e+37 }
 0x347   :  { %v1959_v1 = vpop.eup %1958 }
 0x348   :  { %v231_v3 = vmul.f32 %v1959_v1, %v229_v0  ;;  %vm236_vm5 = vweird.f32 %v1959_v1 }
 0x349   :  { %vm237_vm7 = vmor %vm235_vm6, %vm236_vm5 }
 0x34a   :  { %v232_v5 = vsub.f32 1.0, %v231_v3 }
 0x34c   :  { %v233_v6 = vmul.f32 %v1959_v1, %v232_v5 }
 0x34e   :  { %v234_v8 = vadd.f32 %v1959_v1, %v233_v6 }
 0x350   :  { %v238_v12 = vsel %vm237_vm7, %v1959_v1, %v234_v8 }
 0x351   :  { %v243_v15 = vsel %vm240_vm8, %v242_v13, %v238_v12 }
 0x352   :  { %v246_v18 = vmul.f32 %v243_v15, %v193_v54 }
 0x397   :  { %v249_v14 = vpop.permute.xlu2 %248 }
 0x398   :  { %v251_v17 = vmul.f32 %v249_v14, %v243_v15 }
 0x39a   :  { %253 = vrot.lane.b32.xlu2 %v251_v17, %s2141_s3 }
 0x3f4   :  { %v254_v19 = vpop.permute.xlu2 %253 }
 0x3f5   :  { %v256_v20 = vadd.f32 %v254_v19, %v246_v18 }
 0x3f7   :  { %1960 = vtanh.f32 %v256_v20 }
 0x3fd   :  { %v1961_v21 = vpop.eup %1960 }
 0x3fe   :  { %259 = vrot.lane.b32.xlu0 %v1961_v21, %s2140_s0 }
 0x470   :  { %v260_v23 = vpop.permute.xlu0 %259 }
 0x471   :  { %v262_v25 = vmul.f32 %v260_v23, %v243_v15 }
 0x473   :  { %264 = vrot.lane.b32.xlu1 %v262_v25, %s2141_s3 }
 0x4e5   :  { %v2347_v27 = vpop.permute.xlu1 %264 }
 0x4e6   :  { %1876 = vmatmul.msk.f32.vlgmr.msra.gmra.mxu3 %vm69_vm0, %v2347_v27 }
 0x569   :  { %v285_v29 = vpop.f32.mrf.mxu3 }
 0x56a   :  { %v288_v31 = vadd.f32 %v285_v29, %v2319_v22 }
 0x56c   :  { %1962 = vtanh.f32 %v288_v31  ;;  %v1877_v34 = vmul.f32 -1.442695, %v288_v31 }
 0x56e   :  { %1964 = vpow2.f32 %v1877_v34 }
 0x572   :  { %v1963_v33 = vpop.eup %1962 }
 0x573   :  { %311 = vrot.lane.b32.xlu2 %v1963_v33, %s2140_s0 }
 0x574   :  { %v1965_v35 = vpop.eup %1964 }
 0x575   :  { %v292_v36 = vadd.f32 1.0, %v1965_v35 }
 0x577   :  { %1966 = vrcp.f32 %v292_v36  ;;  %v304_v42 = vand.u32 2147483648, %v292_v36  ;;  %vm298_vm10 = vweird.f32 %v292_v36  ;;  %v302_v43 = vand.u32 2147483647, %v292_v36 }
 0x579   :  { %v305_v44 = vor.u32 1.1754944e-38, %v304_v42  ;;  %vm303_vm12 = vcmp.eq.f32.partialorder %v302_v43, 8.507059e+37 }
 0x57d   :  { %v1967_v37 = vpop.eup %1966 }
 0x57e   :  { %v294_v38 = vmul.f32 %v1967_v37, %v292_v36  ;;  %vm299_vm9 = vweird.f32 %v1967_v37 }
 0x57f   :  { %vm300_vm11 = vmor %vm298_vm10, %vm299_vm9 }
 0x580   :  { %v295_v39 = vsub.f32 1.0, %v294_v38 }
 0x582   :  { %v296_v40 = vmul.f32 %v1967_v37, %v295_v39 }
 0x584   :  { %v297_v41 = vadd.f32 %v1967_v37, %v296_v40 }
 0x586   :  { %v301_v22 = vsel %vm300_vm11, %v1967_v37, %v297_v41 }
 0x587   :  { %v306_v46 = vsel %vm303_vm12, %v305_v44, %v301_v22 }
 0x588   :  { %v309_v48 = vmul.f32 %v306_v46, %v256_v20 }
 0x5cd   :  { %v312_v45 = vpop.permute.xlu2 %311 }
 0x5ce   :  { %v314_v47 = vmul.f32 %v312_v45, %v306_v46 }
 0x5d0   :  { %316 = vrot.lane.b32.xlu0 %v314_v47, %s2141_s3  ;;  %v643_v47 = vld [vmem:[%s2751_s4 + $0x10] sm:$0xff] }
 0x642   :  { %v317_v49 = vpop.permute.xlu0 %316 }
 0x643   :  { %v319_v50 = vadd.f32 %v317_v49, %v309_v48  ;;  %v642_v48 = vld [vmem:[%s2751_s4 + $0x8] sm:$0xff]  ;;  %v641_v49 = vld [vmem:[%s2751_s4] sm:$0xff] }
 0x645   :  { %1968 = vtanh.f32 %v319_v50 }
 0x64b   :  { %v1969_v51 = vpop.eup %1968 }
 0x64c   :  { %322 = vrot.lane.b32.xlu1 %v1969_v51, %s2140_s0 }
 0x6be   :  { %v323_v52 = vpop.permute.xlu1 %322 }
 0x6bf   :  { %v325_v53 = vmul.f32 %v323_v52, %v306_v46  ;;  %v644_v46 = vld [vmem:[%s2751_s4 + $0x18] sm:$0xff] }
 0x6c0   :  { %666 = vmatpush.msra.mxu3 %v644_v46 }
 0x6c1   :  { %327 = vrot.lane.b32.xlu2 %v325_v53, %s2141_s3 }
 0x6c2   :  { %667 = vmatpush.msra.mxu3 %v643_v47 }
 0x6c4   :  { %668 = vmatpush.msra.mxu3 %v642_v48 }
 0x6c6   :  { %669 = vmatpush.msra.mxu3 %v641_v49 }
 0x71b   :  { %v2356_v54 = vpop.permute.xlu2 %327 }
 0x71c   :  { %1878 = vmatmul.msk.f32.vlgmr.msrb.gmra.mxu2 %vm69_vm0, %v2356_v54 }
 0x71d   :  { %595 = vmatpush.msrb.mxu2 %v2236_v2 }
 0x71f   :  { %596 = vmatpush.msrb.mxu2 %v2246_v4 }
 0x721   :  { %597 = vmatpush.msrb.mxu2 %v2262_v7 }
 0x723   :  { %598 = vmatpush.msrb.mxu2 %v2281_v10 }
 0x79f   :  { %v348_v55 = vpop.f32.mrf.mxu2 }
 0x7a0   :  { %v351_v56 = vadd.f32 %v348_v55, %v2321_v24 }
 0x7a2   :  { %1970 = vtanh.f32 %v351_v56  ;;  %v1879_v59 = vmul.f32 -1.442695, %v351_v56 }
 0x7a4   :  { %1972 = vpow2.f32 %v1879_v59 }
 0x7a8   :  { %v1971_v57 = vpop.eup %1970 }
 0x7a9   :  { %374 = vrot.lane.b32.xlu0 %v1971_v57, %s2140_s0 }
 0x7aa   :  { %v1973_v60 = vpop.eup %1972 }
 0x7ab   :  { %v355_v61 = vadd.f32 1.0, %v1973_v60 }
 0x7ad   :  { %1974 = vrcp.f32 %v355_v61  ;;  %v367_v7 = vand.u32 2147483648, %v355_v61  ;;  %vm361_vm14 = vweird.f32 %v355_v61  ;;  %v365_v10 = vand.u32 2147483647, %v355_v61 }
 0x7af   :  { %v368_v1 = vor.u32 1.1754944e-38, %v367_v7  ;;  %vm366_vm1 = vcmp.eq.f32.partialorder %v365_v10, 8.507059e+37 }
 0x7b3   :  { %v1975_v62 = vpop.eup %1974 }
 0x7b4   :  { %v357_v2 = vmul.f32 %v1975_v62, %v355_v61  ;;  %vm362_vm13 = vweird.f32 %v1975_v62 }
 0x7b5   :  { %vm363_vm15 = vmor %vm361_vm14, %vm362_vm13 }
 0x7b6   :  { %v358_v63 = vsub.f32 1.0, %v357_v2 }
 0x7b8   :  { %v359_v4 = vmul.f32 %v1975_v62, %v358_v63 }
 0x7ba   :  { %v360_v0 = vadd.f32 %v1975_v62, %v359_v4 }
 0x7bc   :  { %v364_v24 = vsel %vm363_vm15, %v1975_v62, %v360_v0 }
 0x7bd   :  { %v369_v5 = vsel %vm366_vm1, %v368_v1, %v364_v24 }
 0x7be   :  { %v372_v8 = vmul.f32 %v369_v5, %v319_v50 }
 0x81b   :  { %v375_v3 = vpop.permute.xlu0 %374 }
 0x81c   :  { %v377_v6 = vmul.f32 %v375_v3, %v369_v5 }
 0x81e   :  { %379 = vrot.lane.b32.xlu1 %v377_v6, %s2141_s3  ;;  %v2407_v6 = vld [vmem:[%s2753_s5 + $0x18] sm:$0xff] }
 0x81f   :  { %711 = vmatpush.msrb.mxu1 %v2407_v6 }
 0x890   :  { %v380_v9 = vpop.permute.xlu1 %379 }
 0x891   :  { %v382_v11 = vadd.f32 %v380_v9, %v372_v8  ;;  %v2412_v8 = vld [vmem:[%s2753_s5 + $0x10] sm:$0xff]  ;;  %v2419_v9 = vld [vmem:[%s2753_s5 + $0x8] sm:$0xff] }
 0x892   :  { %712 = vmatpush.msrb.mxu1 %v2412_v8 }
 0x893   :  { %1976 = vtanh.f32 %v382_v11 }
 0x894   :  { %713 = vmatpush.msrb.mxu1 %v2419_v9 }
 0x899   :  { %v1977_v12 = vpop.eup %1976 }
 0x89a   :  { %385 = vrot.lane.b32.xlu2 %v1977_v12, %s2140_s0 }
 0x8f4   :  { %v386_v13 = vpop.permute.xlu2 %385 }
 0x8f5   :  { %v388_v14 = vmul.f32 %v386_v13, %v369_v5 }
 0x8f7   :  { %390 = vrot.lane.b32.xlu0 %v388_v14, %s2141_s3 }
 0x969   :  { %v391_v15 = vpop.permute.xlu0 %390 }
 0x96a   :  { %1880 = vmatmul.msk.f32.vlgmr.msra.gmra.mxu2 %vm69_vm0, %v391_v15 }
 0x96b   :  { %774 = vmatpush.msra.mxu2 %v2407_v6 }
 0x96d   :  { %775 = vmatpush.msra.mxu2 %v2412_v8 }
 0x96f   :  { %776 = vmatpush.msra.mxu2 %v2419_v9 }
 0x9ed   :  { %v411_v17 = vpop.f32.mrf.mxu2 }
 0x9ee   :  { %v414_v18 = vadd.f32 %v411_v17, %v2323_v26 }
 0x9f0   :  { %1978 = vtanh.f32 %v414_v18  ;;  %v1881_v20 = vmul.f32 -1.442695, %v414_v18 }
 0x9f2   :  { %1980 = vpow2.f32 %v1881_v20 }
 0x9f6   :  { %v1979_v19 = vpop.eup %1978 }
 0x9f7   :  { %437 = vrot.lane.b32.xlu1 %v1979_v19, %s2140_s0 }
 0x9f8   :  { %v1981_v21 = vpop.eup %1980 }
 0x9f9   :  { %v418_v23 = vadd.f32 1.0, %v1981_v21 }
 0x9fb   :  { %1982 = vrcp.f32 %v418_v23  ;;  %v430_v35 = vand.u32 2147483648, %v418_v23  ;;  %vm424_vm3 = vweird.f32 %v418_v23  ;;  %v428_v36 = vand.u32 2147483647, %v418_v23 }
 0x9fd   :  { %v431_v37 = vor.u32 1.1754944e-38, %v430_v35  ;;  %vm429_vm5 = vcmp.eq.f32.partialorder %v428_v36, 8.507059e+37 }
 0xa01   :  { %v1983_v25 = vpop.eup %1982 }
 0xa02   :  { %v420_v29 = vmul.f32 %v1983_v25, %v418_v23  ;;  %vm425_vm2 = vweird.f32 %v1983_v25 }
 0xa03   :  { %vm426_vm4 = vmor %vm424_vm3, %vm425_vm2 }
 0xa04   :  { %v421_v31 = vsub.f32 1.0, %v420_v29 }
 0xa06   :  { %v422_v33 = vmul.f32 %v1983_v25, %v421_v31 }
 0xa08   :  { %v423_v34 = vadd.f32 %v1983_v25, %v422_v33 }
 0xa0a   :  { %v427_v26 = vsel %vm426_vm4, %v1983_v25, %v423_v34 }
 0xa0b   :  { %v432_v39 = vsel %vm429_vm5, %v431_v37, %v427_v26 }
 0xa0c   :  { %v435_v41 = vmul.f32 %v432_v39, %v382_v11  ;;  %v2426_v11 = vld [vmem:[%s2753_s5] sm:$0xff] }
 0xa0d   :  { %714 = vmatpush.msrb.mxu1 %v2426_v11  ;;  %777 = vmatpush.msra.mxu2 %v2426_v11 }
 0xa69   :  { %v438_v38 = vpop.permute.xlu1 %437 }
 0xa6a   :  { %v440_v40 = vmul.f32 %v438_v38, %v432_v39 }
 0xa6c   :  { %442 = vrot.lane.b32.xlu2 %v440_v40, %s2141_s3 }
 0xac6   :  { %v443_v42 = vpop.permute.xlu2 %442 }
 0xac7   :  { %v445_v43 = vadd.f32 %v443_v42, %v435_v41 }
 0xac9   :  { %1984 = vtanh.f32 %v445_v43 }
 0xacf   :  { %v1985_v22 = vpop.eup %1984 }
 0xad0   :  { %448 = vrot.lane.b32.xlu0 %v1985_v22, %s2140_s0 }
 0xb42   :  { %v449_v44 = vpop.permute.xlu0 %448 }
 0xb43   :  { %v451_v45 = vmul.f32 %v449_v44, %v432_v39 }
 0xb45   :  { %453 = vrot.lane.b32.xlu1 %v451_v45, %s2141_s3 }
 0xbb7   :  { %v454_v50 = vpop.permute.xlu1 %453 }
 0xbb8   :  { %1882 = vmatmul.msk.f32.vlgmr.msrb.gmra.mxu3 %vm69_vm0, %v454_v50 }
 0xbc0   :  { %1888 = vmatmul.msk.f32.vlgmr.msra.gmra.mxu3 %vm69_vm0, %v2335_v58 }
 0xbc8   :  { %1889 = vmatmul.msk.f32.gmra.mxu3 %vm69_vm0, %v2347_v27 }
 0xbd0   :  { %1890 = vmatmul.msk.f32.gmra.mxu3 %vm69_vm0, %v2356_v54 }
 0xbd8   :  { %1891 = vmatmul.msk.f32.gmra.mxu3 %vm69_vm0, %v391_v15  ;;  %v2447_v15 = vld [vmem:[%s2752_s6] ss:$0 sm:$0xff] }
 0xbe0   :  { %1892 = vmatmul.msk.f32.gmra.mxu3 %vm69_vm0, %v454_v50 }
 0xc3b   :  { %v474_v51 = vpop.f32.mrf.mxu3 }
 0xc3c   :  { %v477_v52 = vadd.f32 %v474_v51, %v2325_v28 }
 0xc3e   :  { %1986 = vtanh.f32 %v477_v52  ;;  %v1883_v55 = vmul.f32 -1.442695, %v477_v52 }
 0xc40   :  { %1988 = vpow2.f32 %v1883_v55 }
 0xc43   :  { %v671_v17 = vpop.f32.mrf.mxu3 }
 0xc44   :  { %v1987_v53 = vpop.eup %1986  ;;  %v672_v18 = vadd.f32 %v2447_v15, %v671_v17 }
 0xc45   :  { %500 = vrot.lane.b32.xlu2 %v1987_v53, %s2140_s0 }
 0xc46   :  { %v1989_v58 = vpop.eup %1988 }
 0xc47   :  { %v481_v56 = vadd.f32 1.0, %v1989_v58 }
 0xc49   :  { %1990 = vrcp.f32 %v481_v56  ;;  %v493_v61 = vand.u32 2147483648, %v481_v56  ;;  %vm487_vm7 = vweird.f32 %v481_v56  ;;  %v491_v62 = vand.u32 2147483647, %v481_v56 }
 0xc4b   :  { %v494_v2 = vor.u32 1.1754944e-38, %v493_v61  ;;  %vm492_vm9 = vcmp.eq.f32.partialorder %v491_v62, 8.507059e+37 }
 0xc4f   :  { %v1991_v27 = vpop.eup %1990 }
 0xc50   :  { %v483_v57 = vmul.f32 %v1991_v27, %v481_v56  ;;  %vm488_vm6 = vweird.f32 %v1991_v27 }
 0xc51   :  { %vm489_vm8 = vmor %vm487_vm7, %vm488_vm6 }
 0xc52   :  { %v484_v59 = vsub.f32 1.0, %v483_v57 }
 0xc54   :  { %v485_v54 = vmul.f32 %v1991_v27, %v484_v59 }
 0xc56   :  { %v486_v60 = vadd.f32 %v1991_v27, %v485_v54 }
 0xc58   :  { %v490_v28 = vsel %vm489_vm8, %v1991_v27, %v486_v60 }
 0xc59   :  { %v495_v4 = vsel %vm492_vm9, %v494_v2, %v490_v28 }
 0xc5a   :  { %v498_v7 = vmul.f32 %v495_v4, %v445_v43 }
 0xc9f   :  { %v501_v63 = vpop.permute.xlu2 %500 }
 0xca0   :  { %v503_v0 = vmul.f32 %v501_v63, %v495_v4 }
 0xca2   :  { %505 = vrot.lane.b32.xlu0 %v503_v0, %s2141_s3 }
 0xd14   :  { %v506_v10 = vpop.permute.xlu0 %505 }
 0xd15   :  { %v2399_v24 = vadd.f32 %v506_v10, %v498_v7 }
 0xd17   :  { %1992 = vtanh.f32 %v2399_v24 }
 0xd1d   :  { %v1993_v1 = vpop.eup %1992 }
 0xd1e   :  { %511 = vrot.lane.b32.xlu1 %v1993_v1, %s2140_s0 }
 0xd90   :  { %v512_v3 = vpop.permute.xlu1 %511 }
 0xd91   :  { %v514_v5 = vmul.f32 %v512_v3, %v495_v4  ;;  %v674_v3 = vpop.f32.mrf.mxu3 }
 0xd93   :  { %516 = vrot.lane.b32.xlu2 %v514_v5, %s2141_s3  ;;  %v675_v5 = vadd.f32 %v2447_v15, %v674_v3 }
 0xded   :  { %v517_v12 = vpop.permute.xlu2 %516 }
 0xdee   :  { %1884 = vmatmul.msk.f32.vlgmr.msra.gmra.mxu1 %vm69_vm0, %v517_v12  ;;  %1893 = vmatmul.msk.f32.gmra.mxu3 %vm69_vm0, %v517_v12 }
 0xdef   :  { %837 = vmatpush.msra.mxu1 %v2407_v6 }
 0xdf1   :  { %838 = vmatpush.msra.mxu1 %v2412_v8 }
 0xdf3   :  { %839 = vmatpush.msra.mxu1 %v2419_v9 }
 0xdf5   :  { %840 = vmatpush.msra.mxu1 %v2426_v11 }
 0xdf6   :  { %715 = vmatmul.f32.vlgmr.msrb.gmra.mxu1 %v2139_v16 }
 0xdf7   :  { %963 = vmatpush.msrb.mxu1 %v2407_v6 }
 0xdf9   :  { %964 = vmatpush.msrb.mxu1 %v2412_v8 }
 0xdfb   :  { %965 = vmatpush.msrb.mxu1 %v2419_v9 }
 0xdfd   :  { %966 = vmatpush.msrb.mxu1 %v2426_v11 }
 0xe6b   :  { %v537_v13 = vpop.f32.mrf.mxu1 }
 0xe6c   :  { %v540_v14 = vadd.f32 %v537_v13, %v2327_v30 }
 0xe6e   :  { %1994 = vtanh.f32 %v540_v14  ;;  %v1885_v25 = vmul.f32 -1.442695, %v540_v14 }
 0xe73   :  { %v716_v19 = vpop.f32.mrf.mxu1 }
 0xe74   :  { %v1995_v20 = vpop.eup %1994  ;;  %v719_v21 = vadd.f32 %v716_v19, %v672_v18 }
 0xe75   :  { %563 = vrot.lane.b32.xlu0 %v1995_v20, %s2140_s0 }
 0xe76   :  { %1996 = vtanh.f32 %v719_v21  ;;  %v1896_v30 = vmul.f32 -1.442695, %v719_v21 }
 0xe77   :  { %1998 = vpow2.f32 %v1885_v25 }
 0xe78   :  { %2000 = vpow2.f32 %v1896_v30 }
 0xe7c   :  { %v1997_v23 = vpop.eup %1996 }
 0xe7d   :  { %742 = vrot.lane.b32.xlu1 %v1997_v23, %s2140_s0  ;;  %v1999_v29 = vpop.eup %1998 }
 0xe7e   :  { %v544_v31 = vadd.f32 1.0, %v1999_v29  ;;  %v2001_v33 = vpop.eup %2000 }
 0xe7f   :  { %v723_v34 = vadd.f32 1.0, %v2001_v33 }
 0xe80   :  { %2002 = vrcp.f32 %v544_v31  ;;  %v556_v42 = vand.u32 2147483648, %v544_v31  ;;  %vm550_vm11 = vweird.f32 %v544_v31  ;;  %v554_v43 = vand.u32 2147483647, %v544_v31 }
 0xe81   :  { %2004 = vrcp.f32 %v723_v34  ;;  %v735_v50 = vand.u32 2147483648, %v723_v34  ;;  %vm729_vm15 = vweird.f32 %v723_v34  ;;  %v733_v51 = vand.u32 2147483647, %v723_v34 }
 0xe82   :  { %v557_v45 = vor.u32 1.1754944e-38, %v556_v42  ;;  %vm555_vm13 = vcmp.eq.f32.partialorder %v554_v43, 8.507059e+37  ;;  %v677_v43 = vpop.f32.mrf.mxu3 }
 0xe83   :  { %v736_v53 = vor.u32 1.1754944e-38, %v735_v50  ;;  %vm734_vm2 = vcmp.eq.f32.partialorder %v733_v51, 8.507059e+37 }
 0xe86   :  { %v2003_v35 = vpop.eup %2002 }
 0xe87   :  { %v546_v36 = vmul.f32 %v2003_v35, %v544_v31  ;;  %v2005_v37 = vpop.eup %2004  ;;  %vm551_vm10 = vweird.f32 %v2003_v35 }
 0xe88   :  { %v725_v39 = vmul.f32 %v2005_v37, %v723_v34  ;;  %vm552_vm12 = vmor %vm550_vm11, %vm551_vm10  ;;  %vm730_vm14 = vweird.f32 %v2005_v37 }
 0xe89   :  { %v547_v26 = vsub.f32 1.0, %v546_v36  ;;  %vm731_vm1 = vmor %vm729_vm15, %vm730_vm14 }
 0xe8a   :  { %v726_v41 = vsub.f32 1.0, %v725_v39 }
 0xe8b   :  { %v548_v38 = vmul.f32 %v2003_v35, %v547_v26 }
 0xe8c   :  { %v727_v44 = vmul.f32 %v2005_v37, %v726_v41 }
 0xe8d   :  { %v549_v40 = vadd.f32 %v2003_v35, %v548_v38 }
 0xe8e   :  { %v728_v49 = vadd.f32 %v2005_v37, %v727_v44 }
 0xe8f   :  { %v553_v22 = vsel %vm552_vm12, %v2003_v35, %v549_v40 }
 0xe90   :  { %v558_v47 = vsel %vm555_vm13, %v557_v45, %v553_v22  ;;  %v732_v52 = vsel %vm731_vm1, %v2005_v37, %v728_v49  ;;  %v678_v22 = vadd.f32 %v2447_v15, %v677_v43 }
 0xe91   :  { %v737_v58 = vsel %vm734_vm2, %v736_v53, %v732_v52  ;;  %v561_v27 = vmul.f32 %v558_v47, %v2399_v24 }
 0xe92   :  { %v740_v60 = vmul.f32 0.0, %v737_v58 }
 0xee7   :  { %v564_v46 = vpop.permute.xlu0 %563 }
 0xee8   :  { %v566_v48 = vmul.f32 %v564_v46, %v558_v47 }
 0xeea   :  { %568 = vrot.lane.b32.xlu2 %v566_v48, %s2141_s3 }
 0xeef   :  { %v743_v55 = vpop.permute.xlu1 %742 }
 0xef0   :  { %v745_v56 = vmul.f32 %v743_v55, %v737_v58 }
 0xef2   :  { %747 = vrot.lane.b32.xlu0 %v745_v56, %s2141_s3 }
 0xf44   :  { %v569_v57 = vpop.permute.xlu2 %568 }
 0xf45   :  { %v2455_v59 = vadd.f32 %v569_v57, %v561_v27 }
 0xf47   :  { %2006 = vtanh.f32 %v2455_v59 }
 0xf4d   :  { %v2007_v54 = vpop.eup %2006 }
 0xf4e   :  { %574 = vrot.lane.b32.xlu1 %v2007_v54, %s2140_s0 }
 0xf64   :  { %v748_v61 = vpop.permute.xlu0 %747 }
 0xf65   :  { %v750_v62 = vadd.f32 %v748_v61, %v740_v60 }
 0xf67   :  { %2008 = vtanh.f32 %v750_v62 }
 0xf6d   :  { %v2009_v28 = vpop.eup %2008 }
 0xf6e   :  { %753 = vrot.lane.b32.xlu2 %v2009_v28, %s2140_s0 }
 0xfc0   :  { %v575_v2 = vpop.permute.xlu1 %574 }
 0xfc1   :  { %v577_v63 = vmul.f32 %v575_v2, %v558_v47 }
 0xfc3   :  { %579 = vrot.lane.b32.xlu0 %v577_v63, %s2141_s3 }
 0xfc8   :  { %v754_v4 = vpop.permute.xlu2 %753 }
 0xfc9   :  { %v756_v0 = vmul.f32 %v754_v4, %v737_v58 }
 0xfcb   :  { %758 = vrot.lane.b32.xlu1 %v756_v0, %s2141_s3 }
0x1035   :  { %v580_v7 = vpop.permute.xlu0 %579 }
0x1036   :  { %1886 = vmatmul.msk.f32.vlgmr.msrb.gmra.mxu2 %vm69_vm0, %v580_v7  ;;  %1894 = vmatmul.msk.f32.gmra.mxu3 %vm69_vm0, %v580_v7 }
0x1037   :  { %900 = vmatpush.msrb.mxu2 %v2407_v6 }
0x1039   :  { %901 = vmatpush.msrb.mxu2 %v2412_v8 }
0x103b   :  { %902 = vmatpush.msrb.mxu2 %v2419_v9 }
0x103d   :  { %v2467_v10 = vpop.permute.xlu1 %758  ;;  %903 = vmatpush.msrb.mxu2 %v2426_v11 }
0x103e   :  { %1897 = vmatmul.msk.f32.vlgmr.msra.gmra.mxu2 %vm69_vm0, %v2467_v10 }
0x103f   :  { %1026 = vmatpush.msra.mxu2 %v2407_v6 }
0x1041   :  { %1027 = vmatpush.msra.mxu2 %v2412_v8 }
0x1043   :  { %1028 = vmatpush.msra.mxu2 %v2419_v9 }
0x1045   :  { %1029 = vmatpush.msra.mxu2 %v2426_v11 }
0x10b9   :  { %v600_v24 = vpop.f32.mrf.mxu2 }
0x10ba   :  { %v2477_v1 = vadd.f32 %v600_v24, %v2329_v32  ;;  %v680_v24 = vpop.f32.mrf.mxu3 }
0x10bb   :  { %v681_v3 = vadd.f32 %v2447_v15, %v680_v24 }
0x10c1   :  { %v779_v12 = vpop.f32.mrf.mxu2 }
0x10c2   :  { %v782_v13 = vadd.f32 %v779_v12, %v675_v5 }
0x10c4   :  { %2010 = vtanh.f32 %v782_v13  ;;  %v1898_v17 = vmul.f32 -1.442695, %v782_v13 }
0x10c6   :  { %2012 = vpow2.f32 %v1898_v17 }
0x10ca   :  { %v2011_v14 = vpop.eup %2010 }
0x10cb   :  { %805 = vrot.lane.b32.xlu2 %v2011_v14, %s2140_s0 }
0x10cc   :  { %v2013_v18 = vpop.eup %2012 }
0x10cd   :  { %v786_v19 = vadd.f32 1.0, %v2013_v18 }
0x10cf   :  { %2014 = vrcp.f32 %v786_v19  ;;  %v798_v30 = vand.u32 2147483648, %v786_v19  ;;  %vm792_vm4 = vweird.f32 %v786_v19  ;;  %v796_v29 = vand.u32 2147483647, %v786_v19 }
0x10d1   :  { %v799_v33 = vor.u32 1.1754944e-38, %v798_v30  ;;  %vm797_vm6 = vcmp.eq.f32.partialorder %v796_v29, 8.507059e+37 }
0x10d5   :  { %v2015_v20 = vpop.eup %2014 }
0x10d6   :  { %v788_v21 = vmul.f32 %v2015_v20, %v786_v19  ;;  %vm793_vm3 = vweird.f32 %v2015_v20 }
0x10d7   :  { %vm794_vm5 = vmor %vm792_vm4, %vm793_vm3 }
0x10d8   :  { %v789_v23 = vsub.f32 1.0, %v788_v21 }
0x10da   :  { %v790_v25 = vmul.f32 %v2015_v20, %v789_v23 }
0x10dc   :  { %v791_v32 = vadd.f32 %v2015_v20, %v790_v25 }
0x10de   :  { %v795_v31 = vsel %vm794_vm5, %v2015_v20, %v791_v32 }
0x10df   :  { %v800_v35 = vsel %vm797_vm6, %v799_v33, %v795_v31 }
0x10e0   :  { %v803_v26 = vmul.f32 %v800_v35, %v750_v62 }
0x1125   :  { %v806_v34 = vpop.permute.xlu2 %805 }
0x1126   :  { %v808_v36 = vmul.f32 %v806_v34, %v800_v35 }
0x1128   :  { %810 = vrot.lane.b32.xlu0 %v808_v36, %s2141_s3 }
0x119a   :  { %v811_v37 = vpop.permute.xlu0 %810 }
0x119b   :  { %v813_v38 = vadd.f32 %v811_v37, %v803_v26 }
0x119d   :  { %2016 = vtanh.f32 %v813_v38 }
0x11a3   :  { %v2017_v39 = vpop.eup %2016 }
0x11a4   :  { %816 = vrot.lane.b32.xlu1 %v2017_v39, %s2140_s0 }
0x1216   :  { %v817_v40 = vpop.permute.xlu1 %816 }
0x1217   :  { %v819_v41 = vmul.f32 %v817_v40, %v800_v35 }
0x1219   :  { %821 = vrot.lane.b32.xlu2 %v819_v41, %s2141_s3 }
0x1273   :  { %v2484_v42 = vpop.permute.xlu2 %821 }
0x1274   :  { %1899 = vmatmul.msk.f32.vlgmr.msra.gmra.mxu1 %vm69_vm0, %v2484_v42 }
0x1275   :  { %1089 = vmatpush.msra.mxu1 %v2407_v6 }
0x1277   :  { %1090 = vmatpush.msra.mxu1 %v2412_v8 }
0x1279   :  { %1091 = vmatpush.msra.mxu1 %v2419_v9 }
0x127b   :  { %1092 = vmatpush.msra.mxu1 %v2426_v11 }
0x12f1   :  { %v842_v44 = vpop.f32.mrf.mxu1 }
0x12f2   :  { %v845_v45 = vadd.f32 %v842_v44, %v678_v22 }
0x12f4   :  { %2018 = vtanh.f32 %v845_v45  ;;  %v1900_v47 = vmul.f32 -1.442695, %v845_v45 }
0x12f6   :  { %2020 = vpow2.f32 %v1900_v47 }
0x12fa   :  { %v2019_v46 = vpop.eup %2018 }
0x12fb   :  { %868 = vrot.lane.b32.xlu0 %v2019_v46, %s2140_s0 }
0x12fc   :  { %v2021_v48 = vpop.eup %2020 }
0x12fd   :  { %v849_v49 = vadd.f32 1.0, %v2021_v48 }
0x12ff   :  { %2022 = vrcp.f32 %v849_v49  ;;  %v861_v58 = vand.u32 2147483648, %v849_v49  ;;  %vm855_vm8 = vweird.f32 %v849_v49  ;;  %v859_v56 = vand.u32 2147483647, %v849_v49 }
0x1301   :  { %v862_v57 = vor.u32 1.1754944e-38, %v861_v58  ;;  %vm860_vm10 = vcmp.eq.f32.partialorder %v859_v56, 8.507059e+37 }
0x1305   :  { %v2023_v50 = vpop.eup %2022 }
0x1306   :  { %v851_v51 = vmul.f32 %v2023_v50, %v849_v49  ;;  %vm856_vm7 = vweird.f32 %v2023_v50 }
0x1307   :  { %vm857_vm9 = vmor %vm855_vm8, %vm856_vm7 }
0x1308   :  { %v852_v52 = vsub.f32 1.0, %v851_v51 }
0x130a   :  { %v853_v53 = vmul.f32 %v2023_v50, %v852_v52 }
0x130c   :  { %v854_v55 = vadd.f32 %v2023_v50, %v853_v53 }
0x130e   :  { %v858_v27 = vsel %vm857_vm9, %v2023_v50, %v854_v55 }
0x130f   :  { %v863_v60 = vsel %vm860_vm10, %v862_v57, %v858_v27 }
0x1310   :  { %v866_v62 = vmul.f32 %v863_v60, %v813_v38  ;;  %v683_v38 = vpop.f32.mrf.mxu3 }
0x1311   :  { %v684_v39 = vadd.f32 %v2447_v15, %v683_v38  ;;  %v1198_v38 = vld [vmem:[%s2754_s7] sm:$0xff] }
0x136d   :  { %v869_v54 = vpop.permute.xlu0 %868 }
0x136e   :  { %v871_v61 = vmul.f32 %v869_v54, %v863_v60 }
0x1370   :  { %873 = vrot.lane.b32.xlu1 %v871_v61, %s2141_s3 }
0x13e2   :  { %v874_v28 = vpop.permute.xlu1 %873 }
0x13e3   :  { %v876_v2 = vadd.f32 %v874_v28, %v866_v62 }
0x13e5   :  { %2024 = vtanh.f32 %v876_v2 }
0x13eb   :  { %v2025_v63 = vpop.eup %2024 }
0x13ec   :  { %879 = vrot.lane.b32.xlu2 %v2025_v63, %s2140_s0  ;;  %v686_v63 = vpop.f32.mrf.mxu3 }
0x1446   :  { %v880_v4 = vpop.permute.xlu2 %879 }
0x1447   :  { %v882_v0 = vmul.f32 %v880_v4, %v863_v60  ;;  %v687_v4 = vadd.f32 %v2447_v15, %v686_v63 }
0x1449   :  { %884 = vrot.lane.b32.xlu0 %v882_v0, %s2141_s3 }
0x14bb   :  { %v2497_v7 = vpop.permute.xlu0 %884 }
0x14bc   :  { %1901 = vmatmul.msk.f32.vlgmr.msrb.gmra.mxu2 %vm69_vm0, %v2497_v7 }
0x14bd   :  { %1152 = vmatpush.msrb.mxu2 %v2407_v6 }
0x14bf   :  { %1153 = vmatpush.msrb.mxu2 %v2412_v8 }
0x14c1   :  { %1154 = vmatpush.msrb.mxu2 %v2419_v9 }
0x14c3   :  { %1155 = vmatpush.msrb.mxu2 %v2426_v11 }
0x153f   :  { %v905_v5 = vpop.f32.mrf.mxu2 }
0x1540   :  { %v908_v12 = vadd.f32 %v905_v5, %v681_v3 }
0x1542   :  { %2026 = vtanh.f32 %v908_v12  ;;  %v1902_v14 = vmul.f32 -1.442695, %v908_v12 }
0x1544   :  { %2028 = vpow2.f32 %v1902_v14 }
0x1548   :  { %v2027_v13 = vpop.eup %2026 }
0x1549   :  { %931 = vrot.lane.b32.xlu1 %v2027_v13, %s2140_s0 }
0x154a   :  { %v2029_v17 = vpop.eup %2028 }
0x154b   :  { %v912_v18 = vadd.f32 1.0, %v2029_v17 }
0x154d   :  { %2030 = vrcp.f32 %v912_v18  ;;  %v924_v11 = vand.u32 2147483648, %v912_v18  ;;  %vm918_vm12 = vweird.f32 %v912_v18  ;;  %v922_v21 = vand.u32 2147483647, %v912_v18 }
0x154f   :  { %v925_v25 = vor.u32 1.1754944e-38, %v924_v11  ;;  %vm923_vm14 = vcmp.eq.f32.partialorder %v922_v21, 8.507059e+37 }
0x1553   :  { %v2031_v6 = vpop.eup %2030 }
0x1554   :  { %v914_v8 = vmul.f32 %v2031_v6, %v912_v18  ;;  %vm919_vm11 = vweird.f32 %v2031_v6 }
0x1555   :  { %vm920_vm13 = vmor %vm918_vm12, %vm919_vm11 }
0x1556   :  { %v915_v19 = vsub.f32 1.0, %v914_v8 }
0x1558   :  { %v916_v9 = vmul.f32 %v2031_v6, %v915_v19 }
0x155a   :  { %v917_v20 = vadd.f32 %v2031_v6, %v916_v9 }
0x155c   :  { %v921_v23 = vsel %vm920_vm13, %v2031_v6, %v917_v20 }
0x155d   :  { %v926_v30 = vsel %vm923_vm14, %v925_v25, %v921_v23 }
0x155e   :  { %v929_v31 = vmul.f32 %v926_v30, %v876_v2 }
0x15bb   :  { %v932_v32 = vpop.permute.xlu1 %931 }
0x15bc   :  { %v934_v29 = vmul.f32 %v932_v32, %v926_v30 }
0x15be   :  { %936 = vrot.lane.b32.xlu2 %v934_v29, %s2141_s3 }
0x1618   :  { %v937_v33 = vpop.permute.xlu2 %936 }
0x1619   :  { %v939_v34 = vadd.f32 %v937_v33, %v929_v31 }
0x161b   :  { %2032 = vtanh.f32 %v939_v34 }
0x1621   :  { %v2033_v35 = vpop.eup %2032 }
0x1622   :  { %942 = vrot.lane.b32.xlu0 %v2033_v35, %s2140_s0  ;;  %v1201_v35 = vld [vmem:[%s2754_s7 + $0x18] sm:$0xff] }
0x1694   :  { %v943_v36 = vpop.permute.xlu0 %942 }
0x1695   :  { %v945_v26 = vmul.f32 %v943_v36, %v926_v30  ;;  %v1200_v36 = vld [vmem:[%s2754_s7 + $0x10] sm:$0xff] }
0x1697   :  { %947 = vrot.lane.b32.xlu1 %v945_v26, %s2141_s3  ;;  %v1199_v26 = vld [vmem:[%s2754_s7 + $0x8] sm:$0xff] }
0x1709   :  { %v2510_v37 = vpop.permute.xlu1 %947 }
0x170a   :  { %1903 = vmatmul.msk.f32.vlgmr.msrb.gmra.mxu1 %vm69_vm0, %v2510_v37 }
0x170b   :  { %1223 = vmatpush.msrb.mxu1 %v1201_v35 }
0x170d   :  { %1224 = vmatpush.msrb.mxu1 %v1200_v36 }
0x170f   :  { %1225 = vmatpush.msrb.mxu1 %v1199_v26 }
0x1711   :  { %1226 = vmatpush.msrb.mxu1 %v1198_v38 }
0x1787   :  { %v968_v40 = vpop.f32.mrf.mxu1 }
0x1788   :  { %v971_v41 = vadd.f32 %v968_v40, %v684_v39  ;;  %v689_v40 = vpop.f32.mrf.mxu3 }
0x178a   :  { %2034 = vtanh.f32 %v971_v41  ;;  %v1904_v22 = vmul.f32 -1.442695, %v971_v41  ;;  %v690_v41 = vadd.f32 %v2447_v15, %v689_v40 }
0x178c   :  { %2036 = vpow2.f32 %v1904_v22 }
0x1790   :  { %v2035_v43 = vpop.eup %2034 }
0x1791   :  { %994 = vrot.lane.b32.xlu2 %v2035_v43, %s2140_s0 }
0x1792   :  { %v2037_v44 = vpop.eup %2036 }
0x1793   :  { %v975_v45 = vadd.f32 1.0, %v2037_v44 }
0x1795   :  { %2038 = vrcp.f32 %v975_v45  ;;  %v987_v51 = vand.u32 2147483648, %v975_v45  ;;  %vm981_vm1 = vweird.f32 %v975_v45  ;;  %v985_v52 = vand.u32 2147483647, %v975_v45 }
0x1797   :  { %v988_v55 = vor.u32 1.1754944e-38, %v987_v51  ;;  %vm986_vm3 = vcmp.eq.f32.partialorder %v985_v52, 8.507059e+37 }
0x179b   :  { %v2039_v46 = vpop.eup %2038 }
0x179c   :  { %v977_v47 = vmul.f32 %v2039_v46, %v975_v45  ;;  %vm982_vm15 = vweird.f32 %v2039_v46 }
0x179d   :  { %vm983_vm2 = vmor %vm981_vm1, %vm982_vm15 }
0x179e   :  { %v978_v48 = vsub.f32 1.0, %v977_v47 }
0x17a0   :  { %v979_v49 = vmul.f32 %v2039_v46, %v978_v48 }
0x17a2   :  { %v980_v50 = vadd.f32 %v2039_v46, %v979_v49 }
0x17a4   :  { %v984_v53 = vsel %vm983_vm2, %v2039_v46, %v980_v50 }
0x17a5   :  { %v989_v56 = vsel %vm986_vm3, %v988_v55, %v984_v53 }
0x17a6   :  { %v992_v57 = vmul.f32 %v989_v56, %v939_v34 }
0x17eb   :  { %v995_v58 = vpop.permute.xlu2 %994 }
0x17ec   :  { %v997_v27 = vmul.f32 %v995_v58, %v989_v56 }
0x17ee   :  { %999 = vrot.lane.b32.xlu0 %v997_v27, %s2141_s3 }
0x1860   :  { %v1000_v54 = vpop.permute.xlu0 %999 }
0x1861   :  { %v1002_v60 = vadd.f32 %v1000_v54, %v992_v57 }
0x1863   :  { %2040 = vtanh.f32 %v1002_v60 }
0x1869   :  { %v2041_v61 = vpop.eup %2040 }
0x186a   :  { %1005 = vrot.lane.b32.xlu1 %v2041_v61, %s2140_s0  ;;  %v2559_v61 = vld [vmem:[%s2756_s8 + $0x18] sm:$0xff] }
0x186b   :  { %1331 = vmatpush.msra.mxu0 %v2559_v61  ;;  %1709 = vmatpush.msrb.mxu3 %v2559_v61 }
0x18dc   :  { %v1006_v62 = vpop.permute.xlu1 %1005 }
0x18dd   :  { %v1008_v28 = vmul.f32 %v1006_v62, %v989_v56  ;;  %v2564_v62 = vld [vmem:[%s2756_s8 + $0x10] sm:$0xff] }
0x18de   :  { %1332 = vmatpush.msra.mxu0 %v2564_v62  ;;  %1710 = vmatpush.msrb.mxu3 %v2564_v62 }
0x18df   :  { %1010 = vrot.lane.b32.xlu2 %v1008_v28, %s2141_s3  ;;  %v2571_v28 = vld [vmem:[%s2756_s8 + $0x8] sm:$0xff] }
0x18e0   :  { %1333 = vmatpush.msra.mxu0 %v2571_v28  ;;  %1711 = vmatpush.msrb.mxu3 %v2571_v28 }
0x1939   :  { %v1011_v2 = vpop.permute.xlu2 %1010 }
0x193a   :  { %1905 = vmatmul.msk.f32.vlgmr.msra.gmra.mxu2 %vm69_vm0, %v1011_v2 }
0x193b   :  { %1268 = vmatpush.msra.mxu2 %v2559_v61 }
0x193d   :  { %1269 = vmatpush.msra.mxu2 %v2564_v62 }
0x193f   :  { %1270 = vmatpush.msra.mxu2 %v2571_v28 }
0x19bd   :  { %v1031_v0 = vpop.f32.mrf.mxu2 }
0x19be   :  { %v1034_v24 = vadd.f32 %v1031_v0, %v687_v4  ;;  %v2608_v0 = vld [vmem:[%s2755_s9] ss:$0 sm:$0xff] }
0x19c0   :  { %2042 = vtanh.f32 %v1034_v24  ;;  %v1906_v5 = vmul.f32 -1.442695, %v1034_v24 }
0x19c2   :  { %2044 = vpow2.f32 %v1906_v5 }
0x19c6   :  { %v2043_v3 = vpop.eup %2042 }
0x19c7   :  { %1057 = vrot.lane.b32.xlu0 %v2043_v3, %s2140_s0 }
0x19c8   :  { %v2045_v12 = vpop.eup %2044 }
0x19c9   :  { %v1038_v13 = vadd.f32 1.0, %v2045_v12 }
0x19cb   :  { %2046 = vrcp.f32 %v1038_v13  ;;  %v1050_v19 = vand.u32 2147483648, %v1038_v13  ;;  %vm1044_vm5 = vweird.f32 %v1038_v13  ;;  %v1048_v9 = vand.u32 2147483647, %v1038_v13 }
0x19cd   :  { %v1051_v11 = vor.u32 1.1754944e-38, %v1050_v19  ;;  %vm1049_vm7 = vcmp.eq.f32.partialorder %v1048_v9, 8.507059e+37 }
0x19d1   :  { %v2047_v14 = vpop.eup %2046 }
0x19d2   :  { %v1040_v17 = vmul.f32 %v2047_v14, %v1038_v13  ;;  %vm1045_vm4 = vweird.f32 %v2047_v14 }
0x19d3   :  { %vm1046_vm6 = vmor %vm1044_vm5, %vm1045_vm4 }
0x19d4   :  { %v1041_v18 = vsub.f32 1.0, %v1040_v17 }
0x19d6   :  { %v1042_v6 = vmul.f32 %v2047_v14, %v1041_v18 }
0x19d8   :  { %v1043_v8 = vadd.f32 %v2047_v14, %v1042_v6 }
0x19da   :  { %v1047_v20 = vsel %vm1046_vm6, %v2047_v14, %v1043_v8 }
0x19db   :  { %v1052_v23 = vsel %vm1049_vm7, %v1051_v11, %v1047_v20 }
0x19dc   :  { %v1055_v32 = vmul.f32 %v1052_v23, %v1002_v60 }
0x1a39   :  { %v1058_v21 = vpop.permute.xlu0 %1057 }
0x1a3a   :  { %v1060_v25 = vmul.f32 %v1058_v21, %v1052_v23 }
0x1a3c   :  { %1062 = vrot.lane.b32.xlu1 %v1060_v25, %s2141_s3 }
0x1aae   :  { %v1063_v30 = vpop.permute.xlu1 %1062 }
0x1aaf   :  { %v1065_v29 = vadd.f32 %v1063_v30, %v1055_v32 }
0x1ab1   :  { %2048 = vtanh.f32 %v1065_v29 }
0x1ab7   :  { %v2049_v31 = vpop.eup %2048 }
0x1ab8   :  { %1068 = vrot.lane.b32.xlu2 %v2049_v31, %s2140_s0 }
0x1b12   :  { %v1069_v33 = vpop.permute.xlu2 %1068 }
0x1b13   :  { %v1071_v34 = vmul.f32 %v1069_v33, %v1052_v23 }
0x1b15   :  { %1073 = vrot.lane.b32.xlu0 %v1071_v34, %s2141_s3 }
0x1b87   :  { %v1074_v39 = vpop.permute.xlu0 %1073 }
0x1b88   :  { %1907 = vmatmul.msk.f32.vlgmr.msra.gmra.mxu1 %vm69_vm0, %v1074_v39 }
0x1b90   :  { %1911 = vmatmul.msk.f32.vlgmr.msrb.gmra.mxu1 %vm69_vm0, %v2467_v10 }
0x1b98   :  { %1912 = vmatmul.msk.f32.gmra.mxu1 %vm69_vm0, %v2484_v42 }
0x1ba0   :  { %1913 = vmatmul.msk.f32.gmra.mxu1 %vm69_vm0, %v2497_v7 }
0x1ba8   :  { %1914 = vmatmul.msk.f32.gmra.mxu1 %vm69_vm0, %v2510_v37 }
0x1bb0   :  { %1915 = vmatmul.msk.f32.gmra.mxu1 %vm69_vm0, %v1011_v2  ;;  %v2579_v2 = vld [vmem:[%s2756_s8] sm:$0xff] }
0x1bb1   :  { %1271 = vmatpush.msra.mxu2 %v2579_v2  ;;  %1334 = vmatpush.msra.mxu0 %v2579_v2 }
0x1bb2   :  { %1712 = vmatpush.msrb.mxu3 %v2579_v2 }
0x1bb3   :  { %1457 = vmatpush.msrb.mxu0 %v2559_v61 }
0x1bb5   :  { %1458 = vmatpush.msrb.mxu0 %v2564_v62 }
0x1bb7   :  { %1459 = vmatpush.msrb.mxu0 %v2571_v28 }
0x1bb8   :  { %1916 = vmatmul.msk.f32.gmra.mxu1 %vm69_vm0, %v1074_v39 }
0x1bb9   :  { %1460 = vmatpush.msrb.mxu0 %v2579_v2 }
0x1c05   :  { %v1094_v43 = vpop.f32.mrf.mxu1 }
0x1c06   :  { %v1097_v22 = vadd.f32 %v1094_v43, %v690_v41 }
0x1c08   :  { %2050 = vtanh.f32 %v1097_v22  ;;  %v1908_v42 = vmul.f32 -1.442695, %v1097_v22 }
0x1c0a   :  { %2052 = vpow2.f32 %v1908_v42 }
0x1c0d   :  { %v1228_v24 = vpop.f32.mrf.mxu1 }
0x1c0e   :  { %v2051_v10 = vpop.eup %2050  ;;  %v1229_v3 = vadd.f32 %v2608_v0, %v1228_v24 }
0x1c0f   :  { %1120 = vrot.lane.b32.xlu1 %v2051_v10, %s2140_s0 }
0x1c10   :  { %v2053_v44 = vpop.eup %2052 }
0x1c11   :  { %v1101_v7 = vadd.f32 1.0, %v2053_v44 }
0x1c13   :  { %2054 = vrcp.f32 %v1101_v7  ;;  %v1113_v49 = vand.u32 2147483648, %v1101_v7  ;;  %vm1107_vm9 = vweird.f32 %v1101_v7  ;;  %v1111_v15 = vand.u32 2147483647, %v1101_v7 }
0x1c15   :  { %v1114_v51 = vor.u32 1.1754944e-38, %v1113_v49  ;;  %vm1112_vm11 = vcmp.eq.f32.partialorder %v1111_v15, 8.507059e+37  ;;  %v1231_v38 = vpop.f32.mrf.mxu1 }
0x1c16   :  { %v1232_v39 = vadd.f32 %v2608_v0, %v1231_v38 }
0x1c19   :  { %v2055_v45 = vpop.eup %2054 }
0x1c1a   :  { %v1103_v37 = vmul.f32 %v2055_v45, %v1101_v7  ;;  %vm1108_vm8 = vweird.f32 %v2055_v45 }
0x1c1b   :  { %vm1109_vm10 = vmor %vm1107_vm9, %vm1108_vm8 }
0x1c1c   :  { %v1104_v46 = vsub.f32 1.0, %v1103_v37 }
0x1c1e   :  { %v1105_v47 = vmul.f32 %v2055_v45, %v1104_v46 }
0x1c20   :  { %v1106_v48 = vadd.f32 %v2055_v45, %v1105_v47 }
0x1c22   :  { %v1110_v50 = vsel %vm1109_vm10, %v2055_v45, %v1106_v48 }
0x1c23   :  { %v1115_v53 = vsel %vm1112_vm11, %v1114_v51, %v1110_v50 }
0x1c24   :  { %v1118_v58 = vmul.f32 %v1115_v53, %v1065_v29 }
0x1c81   :  { %v1121_v52 = vpop.permute.xlu1 %1120 }
0x1c82   :  { %v1123_v55 = vmul.f32 %v1121_v52, %v1115_v53 }
0x1c84   :  { %1125 = vrot.lane.b32.xlu2 %v1123_v55, %s2141_s3 }
0x1cde   :  { %v1126_v56 = vpop.permute.xlu2 %1125 }
0x1cdf   :  { %v2551_v27 = vadd.f32 %v1126_v56, %v1118_v58 }
0x1ce1   :  { %2056 = vtanh.f32 %v2551_v27 }
0x1ce7   :  { %v2057_v57 = vpop.eup %2056 }
0x1ce8   :  { %1131 = vrot.lane.b32.xlu0 %v2057_v57, %s2140_s0 }
0x1d5a   :  { %v1132_v54 = vpop.permute.xlu0 %1131 }
0x1d5b   :  { %v1134_v60 = vmul.f32 %v1132_v54, %v1115_v53 }
0x1d5d   :  { %1136 = vrot.lane.b32.xlu1 %v1134_v60, %s2141_s3 }
0x1dcf   :  { %v1137_v63 = vpop.permute.xlu1 %1136 }
0x1dd0   :  { %1909 = vmatmul.msk.f32.vlgmr.msrb.gmra.mxu2 %vm69_vm0, %v1137_v63  ;;  %1917 = vmatmul.msk.f32.gmra.mxu1 %vm69_vm0, %v1137_v63  ;;  %v1234_v63 = vpop.f32.mrf.mxu1 }
0x1dd1   :  { %1394 = vmatpush.msrb.mxu2 %v2559_v61  ;;  %v1235_v24 = vadd.f32 %v2608_v0, %v1234_v63 }
0x1dd3   :  { %1395 = vmatpush.msrb.mxu2 %v2564_v62 }
0x1dd5   :  { %1396 = vmatpush.msrb.mxu2 %v2571_v28 }
0x1dd7   :  { %1397 = vmatpush.msrb.mxu2 %v2579_v2 }
0x1dd8   :  { %1272 = vmatmul.f32.vlgmr.msra.gmra.mxu2 %v2139_v16 }
0x1dd9   :  { %1520 = vmatpush.msra.mxu2 %v2559_v61 }
0x1ddb   :  { %1521 = vmatpush.msra.mxu2 %v2564_v62 }
0x1ddd   :  { %1522 = vmatpush.msra.mxu2 %v2571_v28 }
0x1ddf   :  { %1523 = vmatpush.msra.mxu2 %v2579_v2 }
0x1e53   :  { %v2603_v4 = vpop.f32.mrf.mxu2 }
0x1e5b   :  { %v1273_v5 = vpop.f32.mrf.mxu2 }
0x1e5c   :  { %v1276_v16 = vadd.f32 %v1273_v5, %v1229_v3 }
0x1e5e   :  { %2058 = vtanh.f32 %v1276_v16  ;;  %v1919_v13 = vmul.f32 -1.442695, %v1276_v16 }
0x1e60   :  { %2060 = vpow2.f32 %v1919_v13 }
0x1e64   :  { %v2059_v12 = vpop.eup %2058 }
0x1e65   :  { %1299 = vrot.lane.b32.xlu2 %v2059_v12, %s2140_s0 }
0x1e66   :  { %v2061_v14 = vpop.eup %2060 }
0x1e67   :  { %v1280_v17 = vadd.f32 1.0, %v2061_v14 }
0x1e69   :  { %2062 = vrcp.f32 %v1280_v17  ;;  %v1292_v20 = vand.u32 2147483648, %v1280_v17  ;;  %vm1286_vm13 = vweird.f32 %v1280_v17  ;;  %v1290_v11 = vand.u32 2147483647, %v1280_v17 }
0x1e6b   :  { %v1293_v23 = vor.u32 1.1754944e-38, %v1292_v20  ;;  %vm1291_vm15 = vcmp.eq.f32.partialorder %v1290_v11, 8.507059e+37 }
0x1e6f   :  { %v2063_v18 = vpop.eup %2062 }
0x1e70   :  { %v1282_v6 = vmul.f32 %v2063_v18, %v1280_v17  ;;  %vm1287_vm12 = vweird.f32 %v2063_v18 }
0x1e71   :  { %vm1288_vm14 = vmor %vm1286_vm13, %vm1287_vm12 }
0x1e72   :  { %v1283_v8 = vsub.f32 1.0, %v1282_v6 }
0x1e74   :  { %v1284_v19 = vmul.f32 %v2063_v18, %v1283_v8 }
0x1e76   :  { %v1285_v9 = vadd.f32 %v2063_v18, %v1284_v19 }
0x1e78   :  { %v1289_v21 = vsel %vm1288_vm14, %v2063_v18, %v1285_v9 }
0x1e79   :  { %v1294_v32 = vsel %vm1291_vm15, %v1293_v23, %v1289_v21 }
0x1e7a   :  { %v1297_v29 = vmul.f32 0.0, %v1294_v32 }
0x1ebf   :  { %v1300_v25 = vpop.permute.xlu2 %1299 }
0x1ec0   :  { %v1302_v30 = vmul.f32 %v1300_v25, %v1294_v32 }
0x1ec2   :  { %1304 = vrot.lane.b32.xlu0 %v1302_v30, %s2141_s3 }
0x1f34   :  { %v1305_v31 = vpop.permute.xlu0 %1304 }
0x1f35   :  { %v1307_v33 = vadd.f32 %v1305_v31, %v1297_v29 }
0x1f37   :  { %2064 = vtanh.f32 %v1307_v33 }
0x1f3d   :  { %v2065_v34 = vpop.eup %2064 }
0x1f3e   :  { %1310 = vrot.lane.b32.xlu1 %v2065_v34, %s2140_s0 }
0x1fb0   :  { %v1311_v35 = vpop.permute.xlu1 %1310 }
0x1fb1   :  { %v1313_v36 = vmul.f32 %v1311_v35, %v1294_v32 }
0x1fb3   :  { %1315 = vrot.lane.b32.xlu2 %v1313_v36, %s2141_s3 }
0x200d   :  { %v1316_v26 = vpop.permute.xlu2 %1315 }
0x200e   :  { %1920 = vmatmul.msk.f32.vlgmr.msra.gmra.mxu0 %vm69_vm0, %v1316_v26 }
0x200f   :  { %1583 = vmatpush.msra.mxu0 %v2559_v61 }
0x2011   :  { %1584 = vmatpush.msra.mxu0 %v2564_v62 }
0x2013   :  { %1585 = vmatpush.msra.mxu0 %v2571_v28 }
0x2015   :  { %1586 = vmatpush.msra.mxu0 %v2579_v2 }
0x208b   :  { %v1336_v40 = vpop.f32.mrf.mxu0 }
0x208c   :  { %v1339_v41 = vadd.f32 %v1336_v40, %v1232_v39 }
0x208e   :  { %2066 = vtanh.f32 %v1339_v41  ;;  %v1921_v22 = vmul.f32 -1.442695, %v1339_v41 }
0x2090   :  { %2068 = vpow2.f32 %v1921_v22 }
0x2094   :  { %v2067_v43 = vpop.eup %2066 }
0x2095   :  { %1362 = vrot.lane.b32.xlu0 %v2067_v43, %s2140_s0 }
0x2096   :  { %v2069_v10 = vpop.eup %2068 }
0x2097   :  { %v1343_v42 = vadd.f32 1.0, %v2069_v10 }
0x2099   :  { %2070 = vrcp.f32 %v1343_v42  ;;  %v1355_v47 = vand.u32 2147483648, %v1343_v42  ;;  %vm1349_vm2 = vweird.f32 %v1343_v42  ;;  %v1353_v48 = vand.u32 2147483647, %v1343_v42 }
0x209b   :  { %v1356_v15 = vor.u32 1.1754944e-38, %v1355_v47  ;;  %vm1354_vm4 = vcmp.eq.f32.partialorder %v1353_v48, 8.507059e+37 }
0x209f   :  { %v2071_v44 = vpop.eup %2070 }
0x20a0   :  { %v1345_v7 = vmul.f32 %v2071_v44, %v1343_v42  ;;  %vm1350_vm1 = vweird.f32 %v2071_v44 }
0x20a1   :  { %vm1351_vm3 = vmor %vm1349_vm2, %vm1350_vm1 }
0x20a2   :  { %v1346_v45 = vsub.f32 1.0, %v1345_v7 }
0x20a4   :  { %v1347_v37 = vmul.f32 %v2071_v44, %v1346_v45 }
0x20a6   :  { %v1348_v46 = vadd.f32 %v2071_v44, %v1347_v37 }
0x20a8   :  { %v1352_v49 = vsel %vm1351_vm3, %v2071_v44, %v1348_v46 }
0x20a9   :  { %v1357_v51 = vsel %vm1354_vm4, %v1356_v15, %v1352_v49 }
0x20aa   :  { %v1360_v53 = vmul.f32 %v1357_v51, %v1307_v33  ;;  %v1237_v33 = vpop.f32.mrf.mxu1 }
0x20ab   :  { %v1238_v34 = vadd.f32 %v2608_v0, %v1237_v33 }
0x2107   :  { %v1363_v50 = vpop.permute.xlu0 %1362 }
0x2108   :  { %v1365_v52 = vmul.f32 %v1363_v50, %v1357_v51 }
0x210a   :  { %1367 = vrot.lane.b32.xlu1 %v1365_v52, %s2141_s3 }
0x217c   :  { %v1368_v55 = vpop.permute.xlu1 %1367 }
0x217d   :  { %v1370_v58 = vadd.f32 %v1368_v55, %v1360_v53 }
0x217f   :  { %2072 = vtanh.f32 %v1370_v58 }
0x2185   :  { %v2073_v56 = vpop.eup %2072 }
0x2186   :  { %1373 = vrot.lane.b32.xlu2 %v2073_v56, %s2140_s0 }
0x21e0   :  { %v1374_v57 = vpop.permute.xlu2 %1373 }
0x21e1   :  { %v1376_v54 = vmul.f32 %v1374_v57, %v1357_v51 }
0x21e3   :  { %1378 = vrot.lane.b32.xlu0 %v1376_v54, %s2141_s3 }
0x2255   :  { %v1379_v60 = vpop.permute.xlu0 %1378 }
0x2256   :  { %1922 = vmatmul.msk.f32.vlgmr.msrb.gmra.mxu2 %vm69_vm0, %v1379_v60 }
0x2257   :  { %1646 = vmatpush.msrb.mxu2 %v2559_v61 }
0x2259   :  { %1647 = vmatpush.msrb.mxu2 %v2564_v62 }
0x225b   :  { %1648 = vmatpush.msrb.mxu2 %v2571_v28 }
0x225d   :  { %1649 = vmatpush.msrb.mxu2 %v2579_v2 }
0x22d9   :  { %v1399_v3 = vpop.f32.mrf.mxu2 }
0x22da   :  { %v1402_v5 = vadd.f32 %v1399_v3, %v1235_v24 }
0x22dc   :  { %2074 = vtanh.f32 %v1402_v5  ;;  %v1923_v12 = vmul.f32 -1.442695, %v1402_v5 }
0x22de   :  { %2076 = vpow2.f32 %v1923_v12 }
0x22e2   :  { %v2075_v16 = vpop.eup %2074 }
0x22e3   :  { %1425 = vrot.lane.b32.xlu1 %v2075_v16, %s2140_s0 }
0x22e4   :  { %v2077_v13 = vpop.eup %2076 }
0x22e5   :  { %v1406_v14 = vadd.f32 1.0, %v2077_v13 }
0x22e7   :  { %2078 = vrcp.f32 %v1406_v14  ;;  %v1418_v2 = vand.u32 2147483648, %v1406_v14  ;;  %vm1412_vm6 = vweird.f32 %v1406_v14  ;;  %v1416_v6 = vand.u32 2147483647, %v1406_v14 }
0x22e9   :  { %v1419_v19 = vor.u32 1.1754944e-38, %v1418_v2  ;;  %vm1417_vm8 = vcmp.eq.f32.partialorder %v1416_v6, 8.507059e+37 }
0x22ed   :  { %v2079_v61 = vpop.eup %2078 }
0x22ee   :  { %v1408_v62 = vmul.f32 %v2079_v61, %v1406_v14  ;;  %vm1413_vm5 = vweird.f32 %v2079_v61 }
0x22ef   :  { %vm1414_vm7 = vmor %vm1412_vm6, %vm1413_vm5 }
0x22f0   :  { %v1409_v17 = vsub.f32 1.0, %v1408_v62 }
0x22f2   :  { %v1410_v28 = vmul.f32 %v2079_v61, %v1409_v17 }
0x22f4   :  { %v1411_v18 = vadd.f32 %v2079_v61, %v1410_v28 }
0x22f6   :  { %v1415_v8 = vsel %vm1414_vm7, %v2079_v61, %v1411_v18 }
0x22f7   :  { %v1420_v20 = vsel %vm1417_vm8, %v1419_v19, %v1415_v8 }
0x22f8   :  { %v1423_v21 = vmul.f32 %v1420_v20, %v1370_v58  ;;  %v1240_v58 = vpop.f32.mrf.mxu1 }
0x22f9   :  { %v1241_v56 = vadd.f32 %v2608_v0, %v1240_v58 }
0x2300   :  { %v1243_v33 = vpop.f32.mrf.mxu1 }
0x2355   :  { %v1426_v9 = vpop.permute.xlu1 %1425 }
0x2356   :  { %v1428_v11 = vmul.f32 %v1426_v9, %v1420_v20 }
0x2358   :  { %1430 = vrot.lane.b32.xlu2 %v1428_v11, %s2141_s3 }
0x23b2   :  { %v1431_v23 = vpop.permute.xlu2 %1430 }
0x23b3   :  { %v1433_v25 = vadd.f32 %v1431_v23, %v1423_v21 }
0x23b5   :  { %2080 = vtanh.f32 %v1433_v25 }
0x23bb   :  { %v2081_v32 = vpop.eup %2080 }
0x23bc   :  { %1436 = vrot.lane.b32.xlu0 %v2081_v32, %s2140_s0  ;;  %v1887_v32 = vmul.f32 -1.442695, %v2477_v1 }
0x242e   :  { %v1437_v30 = vpop.permute.xlu0 %1436 }
0x242f   :  { %v1439_v29 = vmul.f32 %v1437_v30, %v1420_v20 }
0x2431   :  { %1441 = vrot.lane.b32.xlu1 %v1439_v29, %s2141_s3 }
0x24a3   :  { %v1442_v31 = vpop.permute.xlu1 %1441 }
0x24a4   :  { %1924 = vmatmul.msk.f32.vlgmr.msrb.gmra.mxu0 %vm69_vm0, %v1442_v31 }
0x2521   :  { %v1462_v35 = vpop.f32.mrf.mxu0 }
0x2522   :  { %v1465_v36 = vadd.f32 %v1462_v35, %v1238_v34  ;;  %v1244_v35 = vadd.f32 %v2608_v0, %v1243_v33 }
0x2524   :  { %2082 = vtanh.f32 %v1465_v36  ;;  %v1925_v38 = vmul.f32 -1.442695, %v1465_v36 }
0x2526   :  { %2084 = vpow2.f32 %v1925_v38 }
0x252a   :  { %v2083_v26 = vpop.eup %2082 }
0x252b   :  { %1488 = vrot.lane.b32.xlu2 %v2083_v26, %s2140_s0 }
0x252c   :  { %v2085_v39 = vpop.eup %2084 }
0x252d   :  { %v1469_v40 = vadd.f32 1.0, %v2085_v39 }
0x252f   :  { %2086 = vrcp.f32 %v1469_v40  ;;  %v1481_v44 = vand.u32 2147483648, %v1469_v40  ;;  %vm1475_vm10 = vweird.f32 %v1469_v40  ;;  %v1479_v7 = vand.u32 2147483647, %v1469_v40 }
0x2531   :  { %v1482_v37 = vor.u32 1.1754944e-38, %v1481_v44  ;;  %vm1480_vm12 = vcmp.eq.f32.partialorder %v1479_v7, 8.507059e+37 }
0x2535   :  { %v2087_v41 = vpop.eup %2086 }
0x2536   :  { %v1471_v43 = vmul.f32 %v2087_v41, %v1469_v40  ;;  %vm1476_vm9 = vweird.f32 %v2087_v41 }
0x2537   :  { %vm1477_vm11 = vmor %vm1475_vm10, %vm1476_vm9 }
0x2538   :  { %v1472_v22 = vsub.f32 1.0, %v1471_v43 }
0x253a   :  { %v1473_v10 = vmul.f32 %v2087_v41, %v1472_v22 }
0x253c   :  { %v1474_v42 = vadd.f32 %v2087_v41, %v1473_v10 }
0x253e   :  { %v1478_v45 = vsel %vm1477_vm11, %v2087_v41, %v1474_v42 }
0x253f   :  { %v1483_v47 = vsel %vm1480_vm12, %v1482_v37, %v1478_v45 }
0x2540   :  { %v1486_v49 = vmul.f32 %v1483_v47, %v1433_v25 }
0x2585   :  { %v1489_v46 = vpop.permute.xlu2 %1488 }
0x2586   :  { %v1491_v48 = vmul.f32 %v1489_v46, %v1483_v47 }
0x2588   :  { %1493 = vrot.lane.b32.xlu0 %v1491_v48, %s2141_s3 }
0x25fa   :  { %v1494_v15 = vpop.permute.xlu0 %1493 }
0x25fb   :  { %v1496_v50 = vadd.f32 %v1494_v15, %v1486_v49 }
0x25fd   :  { %2088 = vtanh.f32 %v1496_v50 }
0x2603   :  { %v2089_v51 = vpop.eup %2088 }
0x2604   :  { %1499 = vrot.lane.b32.xlu1 %v2089_v51, %s2140_s0 }
0x2676   :  { %v1500_v52 = vpop.permute.xlu1 %1499 }
0x2677   :  { %v1502_v53 = vmul.f32 %v1500_v52, %v1483_v47 }
0x2679   :  { %1504 = vrot.lane.b32.xlu2 %v1502_v53, %s2141_s3 }
0x26d3   :  { %v1505_v55 = vpop.permute.xlu2 %1504 }
0x26d4   :  { %1926 = vmatmul.msk.f32.vlgmr.msra.gmra.mxu2 %vm69_vm0, %v1505_v55 }
0x2757   :  { %v1525_v57 = vpop.f32.mrf.mxu2 }
0x2758   :  { %v1528_v54 = vadd.f32 %v1525_v57, %v1241_v56 }
0x275a   :  { %2090 = vtanh.f32 %v1528_v54  ;;  %v1927_v63 = vmul.f32 -1.442695, %v1528_v54 }
0x275c   :  { %2092 = vpow2.f32 %v1927_v63 }
0x2760   :  { %v2091_v60 = vpop.eup %2090 }
0x2761   :  { %1551 = vrot.lane.b32.xlu0 %v2091_v60, %s2140_s0 }
0x2762   :  { %v2093_v24 = vpop.eup %2092 }
0x2763   :  { %v1532_v3 = vadd.f32 1.0, %v2093_v24 }
0x2765   :  { %2094 = vrcp.f32 %v1532_v3  ;;  %v1544_v61 = vand.u32 2147483648, %v1532_v3  ;;  %vm1538_vm14 = vweird.f32 %v1532_v3  ;;  %v1542_v62 = vand.u32 2147483647, %v1532_v3 }
0x2767   :  { %v1545_v28 = vor.u32 1.1754944e-38, %v1544_v61  ;;  %vm1543_vm1 = vcmp.eq.f32.partialorder %v1542_v62, 8.507059e+37 }
0x276b   :  { %v2095_v5 = vpop.eup %2094 }
0x276c   :  { %v1534_v16 = vmul.f32 %v2095_v5, %v1532_v3  ;;  %vm1539_vm13 = vweird.f32 %v2095_v5 }
0x276d   :  { %vm1540_vm15 = vmor %vm1538_vm14, %vm1539_vm13 }
0x276e   :  { %v1535_v12 = vsub.f32 1.0, %v1534_v16 }
0x2770   :  { %v1536_v13 = vmul.f32 %v2095_v5, %v1535_v12 }
0x2772   :  { %v1537_v14 = vadd.f32 %v2095_v5, %v1536_v13 }
0x2774   :  { %v1541_v17 = vsel %vm1540_vm15, %v2095_v5, %v1537_v14 }
0x2775   :  { %v1546_v2 = vsel %vm1543_vm1, %v1545_v28, %v1541_v17 }
0x2776   :  { %v1549_v8 = vmul.f32 %v1546_v2, %v1496_v50 }
0x27d3   :  { %v1552_v18 = vpop.permute.xlu0 %1551 }
0x27d4   :  { %v1554_v6 = vmul.f32 %v1552_v18, %v1546_v2  ;;  %v2138_v18 = vld [vmem:[%s2752_s6] ss:$0 sm:$0xff] }
0x27d6   :  { %1556 = vrot.lane.b32.xlu1 %v1554_v6, %s2141_s3 }
0x2848   :  { %v1557_v19 = vpop.permute.xlu1 %1556 }
0x2849   :  { %v2645_v9 = vadd.f32 %v1557_v19, %v1549_v8 }
0x284b   :  { %2096 = vtanh.f32 %v2645_v9 }
0x284c   :  { %2098 = vtanh.f32 %v2477_v1 }
0x284d   :  { %2100 = vpow2.f32 %v1887_v32 }
0x2851   :  { %v2097_v20 = vpop.eup %2096 }
0x2852   :  { %1562 = vrot.lane.b32.xlu2 %v2097_v20, %s2140_s0  ;;  %v2099_v11 = vpop.eup %2098 }
0x2853   :  { %v2101_v30 = vpop.eup %2100 }
0x2854   :  { %v607_v29 = vadd.f32 1.0, %v2101_v30 }
0x2856   :  { %2102 = vrcp.f32 %v607_v29  ;;  %v619_v43 = vand.u32 2147483648, %v607_v29  ;;  %vm613_vm3 = vweird.f32 %v607_v29  ;;  %v617_v1 = vand.u32 2147483647, %v607_v29 }
0x2858   :  { %v620_v10 = vor.u32 1.1754944e-38, %v619_v43  ;;  %vm618_vm5 = vcmp.eq.f32.partialorder %v617_v1, 8.507059e+37 }
0x285a   :  { %626 = vrot.lane.b32.xlu2 %v2099_v11, %s2140_s0 }
0x285c   :  { %v2103_v31 = vpop.eup %2102 }
0x285d   :  { %v609_v34 = vmul.f32 %v2103_v31, %v607_v29  ;;  %vm614_vm2 = vweird.f32 %v2103_v31 }
0x285e   :  { %vm615_vm4 = vmor %vm613_vm3, %vm614_vm2 }
0x285f   :  { %v610_v36 = vsub.f32 1.0, %v609_v34 }
0x2861   :  { %v611_v39 = vmul.f32 %v2103_v31, %v610_v36 }
0x2863   :  { %v612_v40 = vadd.f32 %v2103_v31, %v611_v39 }
0x2865   :  { %v616_v22 = vsel %vm615_vm4, %v2103_v31, %v612_v40 }
0x2866   :  { %v621_v44 = vsel %vm618_vm5, %v620_v10, %v616_v22 }
0x2867   :  { %v624_v54 = vmul.f32 %v621_v44, %v2455_v59 }
0x28ac   :  { %v1563_v21 = vpop.permute.xlu2 %1562 }
0x28ad   :  { %v1565_v23 = vmul.f32 %v1563_v21, %v1546_v2  ;;  %v1246_v21 = vpop.f32.mrf.mxu1 }
0x28af   :  { %1567 = vrot.lane.b32.xlu0 %v1565_v23, %s2141_s3 }
0x28b4   :  { %v627_v42 = vpop.permute.xlu2 %626 }
0x28b5   :  { %v629_v7 = vmul.f32 %v627_v42, %v621_v44 }
0x2921   :  { %v1568_v25 = vpop.permute.xlu0 %1567 }
0x2922   :  { %1928 = vmatmul.msk.f32.vlgmr.msra.gmra.mxu0 %vm69_vm0, %v1568_v25  ;;  %v1247_v25 = vadd.f32 %v2608_v0, %v1246_v21 }
0x299f   :  { %v1588_v26 = vpop.f32.mrf.mxu0 }
0x29a0   :  { %v1591_v38 = vadd.f32 %v1588_v26, %v1244_v35 }
0x29a2   :  { %2104 = vtanh.f32 %v1591_v38  ;;  %v1929_v45 = vmul.f32 -1.442695, %v1591_v38 }
0x29a4   :  { %2106 = vpow2.f32 %v1929_v45 }
0x29a8   :  { %v2105_v41 = vpop.eup %2104 }
0x29a9   :  { %1614 = vrot.lane.b32.xlu1 %v2105_v41, %s2140_s0 }
0x29aa   :  { %v2107_v37 = vpop.eup %2106 }
0x29ab   :  { %v1595_v46 = vadd.f32 1.0, %v2107_v37 }
0x29ad   :  { %2108 = vrcp.f32 %v1595_v46  ;;  %v1607_v51 = vand.u32 2147483648, %v1595_v46  ;;  %vm1601_vm7 = vweird.f32 %v1595_v46  ;;  %v1605_v52 = vand.u32 2147483647, %v1595_v46 }
0x29af   :  { %v1608_v55 = vor.u32 1.1754944e-38, %v1607_v51  ;;  %vm1606_vm9 = vcmp.eq.f32.partialorder %v1605_v52, 8.507059e+37 }
0x29b1   :  { %631 = vrot.lane.b32.xlu1 %v629_v7, %s2141_s3 }
0x29b3   :  { %v2109_v47 = vpop.eup %2108 }
0x29b4   :  { %v1597_v48 = vmul.f32 %v2109_v47, %v1595_v46  ;;  %vm1602_vm6 = vweird.f32 %v2109_v47 }
0x29b5   :  { %vm1603_vm8 = vmor %vm1601_vm7, %vm1602_vm6 }
0x29b6   :  { %v1598_v49 = vsub.f32 1.0, %v1597_v48 }
0x29b8   :  { %v1599_v15 = vmul.f32 %v2109_v47, %v1598_v49 }
0x29ba   :  { %v1600_v50 = vadd.f32 %v2109_v47, %v1599_v15 }
0x29bc   :  { %v1604_v53 = vsel %vm1603_vm8, %v2109_v47, %v1600_v50 }
0x29bd   :  { %v1609_v56 = vsel %vm1606_vm9, %v1608_v55, %v1604_v53 }
0x29be   :  { %v1612_v3 = vmul.f32 %v1609_v56, %v2645_v9 }
0x2a1b   :  { %v1615_v58 = vpop.permute.xlu1 %1614 }
0x2a1c   :  { %v1617_v57 = vmul.f32 %v1615_v58, %v1609_v56 }
0x2a1e   :  { %1619 = vrot.lane.b32.xlu0 %v1617_v57, %s2141_s3 }
0x2a23   :  { %v632_v60 = vpop.permute.xlu1 %631 }
0x2a24   :  { %v634_v63 = vadd.f32 %v632_v60, %v624_v54 }
0x2a26   :  { %2110 = vtanh.f32 %v634_v63 }
0x2a2c   :  { %v2111_v24 = vpop.eup %2110 }
0x2a2d   :  { %637 = vrot.lane.b32.xlu0 %v2111_v24, %s2140_s0 }
0x2a90   :  { %v1620_v5 = vpop.permute.xlu0 %1619 }
0x2a91   :  { %v2661_v16 = vadd.f32 %v1620_v5, %v1612_v3 }
0x2a93   :  { %2112 = vtanh.f32 %v2661_v16 }
0x2a99   :  { %v2113_v12 = vpop.eup %2112 }
0x2a9a   :  { %1625 = vrot.lane.b32.xlu2 %v2113_v12, %s2140_s0 }
0x2a9f   :  { %v638_v13 = vpop.permute.xlu0 %637 }
0x2aa0   :  { %v640_v14 = vmul.f32 %v638_v13, %v621_v44 }
0x2aa2   :  { %650 = vrot.lane.b32.xlu2 %v640_v14, %s2141_s3 }
0x2af4   :  { %v1626_v59 = vpop.permute.xlu2 %1625 }
0x2af5   :  { %v1628_v61 = vmul.f32 %v1626_v59, %v1609_v56 }
0x2af7   :  { %1630 = vrot.lane.b32.xlu1 %v1628_v61, %s2141_s3 }
0x2afc   :  { %v651_v62 = vpop.permute.xlu2 %650 }
0x2afd   :  { %1895 = vmatmul.msk.f32.gmra.mxu3 %vm69_vm0, %v651_v62 }
0x2b69   :  { %v1631_v17 = vpop.permute.xlu1 %1630 }
0x2b6a   :  { %1930 = vmatmul.msk.f32.vlgmr.msrb.gmra.mxu2 %vm69_vm0, %v1631_v17 }
0x2b80   :  { %v692_v28 = vpop.f32.mrf.mxu3 }
0x2b81   :  { %v693_v2 = vadd.f32 %v2138_v18, %v692_v28 }
0x2b83   :  { %v1160_v6 = vadd.f32 %v2603_v4, %v693_v2 }
0x2b85   :  { %2114 = vtanh.f32 %v1160_v6  ;;  %v1910_v19 = vmul.f32 -1.442695, %v1160_v6 }
0x2b87   :  { %2116 = vpow2.f32 %v1910_v19 }
0x2b8b   :  { %v2115_v8 = vpop.eup %2114 }
0x2b8c   :  { %1183 = vrot.lane.b32.xlu1 %v2115_v8, %s2140_s0 }
0x2b8d   :  { %v2117_v9 = vpop.eup %2116 }
0x2b8e   :  { %v1164_v20 = vadd.f32 1.0, %v2117_v9 }
0x2b90   :  { %2118 = vrcp.f32 %v1164_v20  ;;  %v1176_v34 = vand.u32 2147483648, %v1164_v20  ;;  %vm1170_vm11 = vweird.f32 %v1164_v20  ;;  %v1174_v35 = vand.u32 2147483647, %v1164_v20 }
0x2b92   :  { %v1177_v26 = vor.u32 1.1754944e-38, %v1176_v34  ;;  %vm1175_vm13 = vcmp.eq.f32.partialorder %v1174_v35, 8.507059e+37 }
0x2b96   :  { %v2119_v11 = vpop.eup %2118 }
0x2b97   :  { %v1166_v23 = vmul.f32 %v2119_v11, %v1164_v20  ;;  %vm1171_vm10 = vweird.f32 %v2119_v11 }
0x2b98   :  { %vm1172_vm12 = vmor %vm1170_vm11, %vm1171_vm10 }
0x2b99   :  { %v1167_v29 = vsub.f32 1.0, %v1166_v23 }
0x2b9b   :  { %v1168_v31 = vmul.f32 %v2119_v11, %v1167_v29  ;;  %v1758_v29 = vld [vmem:[%s2758_s10 + $0x18] sm:$0xff] }
0x2b9c   :  { %1780 = vmatpush.msrb.mxu0 %v1758_v29 }
0x2b9d   :  { %v1169_v33 = vadd.f32 %v2119_v11, %v1168_v31  ;;  %v1757_v31 = vld [vmem:[%s2758_s10 + $0x10] sm:$0xff] }
0x2b9e   :  { %1781 = vmatpush.msrb.mxu0 %v1757_v31 }
0x2b9f   :  { %v1173_v36 = vsel %vm1172_vm12, %v2119_v11, %v1169_v33  ;;  %v1755_v33 = vld [vmem:[%s2758_s10] sm:$0xff] }
0x2ba0   :  { %v1178_v39 = vsel %vm1175_vm13, %v1177_v26, %v1173_v36  ;;  %v1792_v36 = vld [vmem:[%s2759_s12 + $0x18] sm:$0xff]  ;;  %v1791_v26 = vld [vmem:[%s2759_s12 + $0x10] sm:$0xff] }
0x2ba1   :  { %v1181_v50 = vmul.f32 %v1178_v39, %v2551_v27  ;;  %1812 = vmatpush.msra.mxu2 %v1792_v36 }
0x2ba3   :  { %1813 = vmatpush.msra.mxu2 %v1791_v26 }
0x2bed   :  { %v1651_v32 = vpop.f32.mrf.mxu2 }
0x2bee   :  { %v1654_v30 = vadd.f32 %v1651_v32, %v1247_v25 }
0x2bf0   :  { %2120 = vtanh.f32 %v1654_v30  ;;  %v1931_v41 = vmul.f32 -1.442695, %v1654_v30 }
0x2bf2   :  { %2122 = vpow2.f32 %v1931_v41  ;;  %v1826_v41 = vld [vmem:[%s2761_s14 + $0x28] sm:$0xff] }
0x2bf3   :  { %1845 = vmatpush.msra.mxu3 %v1826_v41 }
0x2bf6   :  { %v2121_v4 = vpop.eup %2120 }
0x2bf7   :  { %1677 = vrot.lane.b32.xlu0 %v2121_v4, %s2140_s0  ;;  %v1756_v4 = vld [vmem:[%s2758_s10 + $0x8] sm:$0xff] }
0x2bf8   :  { %v2123_v43 = vpop.eup %2122  ;;  %1782 = vmatpush.msrb.mxu0 %v1756_v4 }
0x2bf9   :  { %v1658_v1 = vadd.f32 1.0, %v2123_v43  ;;  %v1825_v43 = vld [vmem:[%s2761_s14 + $0x20] sm:$0xff] }
0x2bfa   :  { %1783 = vmatpush.msrb.mxu0 %v1755_v33  ;;  %1846 = vmatpush.msra.mxu3 %v1825_v43 }
0x2bfb   :  { %2124 = vrcp.f32 %v1658_v1  ;;  %v1670_v45 = vand.u32 2147483648, %v1658_v1  ;;  %vm1664_vm15 = vweird.f32 %v1658_v1  ;;  %v1668_v37 = vand.u32 2147483647, %v1658_v1 }
0x2bfd   :  { %v1671_v47 = vor.u32 1.1754944e-38, %v1670_v45  ;;  %vm1669_vm2 = vcmp.eq.f32.partialorder %v1668_v37, 8.507059e+37  ;;  %v1822_v45 = vld [vmem:[%s2761_s14 + $0x8] sm:$0xff]  ;;  %v1821_v37 = vld [vmem:[%s2761_s14] sm:$0xff] }
0x2bfe   :  { %v1184_v38 = vpop.permute.xlu1 %1183 }
0x2bff   :  { %v1186_v40 = vmul.f32 %v1184_v38, %v1178_v39 }
0x2c01   :  { %1188 = vrot.lane.b32.xlu0 %v1186_v40, %s2141_s3  ;;  %v2125_v22 = vpop.eup %2124  ;;  %v1789_v40 = vld [vmem:[%s2759_s12] sm:$0xff] }
0x2c02   :  { %v1660_v10 = vmul.f32 %v2125_v22, %v1658_v1  ;;  %vm1665_vm14 = vweird.f32 %v2125_v22  ;;  %v1824_v1 = vld [vmem:[%s2761_s14 + $0x18] sm:$0xff] }
0x2c03   :  { %vm1666_vm1 = vmor %vm1664_vm15, %vm1665_vm14  ;;  %1847 = vmatpush.msra.mxu3 %v1824_v1 }
0x2c04   :  { %v1661_v42 = vsub.f32 1.0, %v1660_v10 }
0x2c06   :  { %v1662_v44 = vmul.f32 %v2125_v22, %v1661_v42 }
0x2c08   :  { %v1663_v7 = vadd.f32 %v2125_v22, %v1662_v44 }
0x2c0a   :  { %v1667_v46 = vsel %vm1666_vm1, %v2125_v22, %v1663_v7  ;;  %v1943_v22 = vld [vmem:[%s2757_s11] ss:$0 sm:$0xff]  ;;  %v1823_v7 = vld [vmem:[%s2761_s14 + $0x10] sm:$0xff] }
0x2c0b   :  { %v1672_v49 = vsel %vm1669_vm2, %v1671_v47, %v1667_v46  ;;  %1848 = vmatpush.msra.mxu3 %v1823_v7  ;;  %v1944_v46 = vld [vmem:[%s2760_s13] ss:$0 sm:$0xff] }
0x2c0c   :  { %v1675_v55 = vmul.f32 %v1672_v49, %v2661_v16 }
0x2c0d   :  { %1849 = vmatpush.msra.mxu3 %v1822_v45 }
0x2c0f   :  { %1850 = vmatpush.msra.mxu3 %v1821_v37 }
0x2c69   :  { %v1678_v48 = vpop.permute.xlu0 %1677 }
0x2c6a   :  { %v1680_v15 = vmul.f32 %v1678_v48, %v1672_v49 }
0x2c6c   :  { %1682 = vrot.lane.b32.xlu2 %v1680_v15, %s2141_s3  ;;  %v1855_v15 = vlaneseq }
0x2c73   :  { %v1189_v51 = vpop.permute.xlu0 %1188 }
0x2c74   :  { %v1191_v52 = vadd.f32 %v1189_v51, %v1181_v50  ;;  %v1945_v50 = vld [vmem:[%s2762_s15] ss:$0 sm:$0xff]  ;;  %v1856_v51 = vand.u32 127, %v1855_v15 }
0x2c76   :  { %2126 = vtanh.f32 %v1191_v52  ;;  %vm1857_vm7 = vcmp.lt.s32.totalorder %v1856_v51, 2 }
0x2c7c   :  { %v2127_v53 = vpop.eup %2126 }
0x2c7d   :  { %1194 = vrot.lane.b32.xlu2 %v2127_v53, %s2140_s0 }
0x2cc6   :  { %v1683_v58 = vpop.permute.xlu2 %1682 }
0x2cc7   :  { %v1685_v56 = vadd.f32 %v1683_v58, %v1675_v55 }
0x2cc9   :  { %2128 = vtanh.f32 %v1685_v56 }
0x2ccf   :  { %v2129_v57 = vpop.eup %2128 }
0x2cd0   :  { %1688 = vrot.lane.b32.xlu1 %v2129_v57, %s2140_s0 }
0x2cd7   :  { %v1195_v54 = vpop.permute.xlu2 %1194 }
0x2cd8   :  { %v1197_v60 = vmul.f32 %v1195_v54, %v1178_v39  ;;  %v1790_v39 = vld [vmem:[%s2759_s12 + $0x8] sm:$0xff] }
0x2cd9   :  { %1814 = vmatpush.msra.mxu2 %v1790_v39 }
0x2cda   :  { %1207 = vrot.lane.b32.xlu1 %v1197_v60, %s2141_s3 }
0x2cdb   :  { %1815 = vmatpush.msra.mxu2 %v1789_v40 }
0x2d42   :  { %v1689_v63 = vpop.permute.xlu1 %1688 }
0x2d43   :  { %v1691_v27 = vmul.f32 %v1689_v63, %v1672_v49 }
0x2d45   :  { %1693 = vrot.lane.b32.xlu0 %v1691_v27, %s2141_s3 }
0x2d4c   :  { %v1208_v24 = vpop.permute.xlu1 %1207 }
0x2d4d   :  { %1918 = vmatmul.msk.f32.gmra.mxu1 %vm69_vm0, %v1208_v24 }
0x2db7   :  { %v1694_v3 = vpop.permute.xlu0 %1693 }
0x2db8   :  { %1932 = vmatmul.msk.f32.vlgmr.msrb.gmra.mxu3 %vm69_vm0, %v1694_v3 }
0x2dca   :  { %v1249_v5 = vpop.f32.mrf.mxu1 }
0x2dcb   :  { %v1250_v16 = vadd.f32 %v2608_v0, %v1249_v5 }
0x2e3b   :  { %v1714_v12 = vpop.f32.mrf.mxu3 }
0x2e3c   :  { %v1717_v13 = vadd.f32 %v1714_v12, %v1250_v16 }
0x2e3e   :  { %2130 = vtanh.f32 %v1717_v13  ;;  %v1933_v59 = vmul.f32 -1.442695, %v1717_v13 }
0x2e40   :  { %2132 = vpow2.f32 %v1933_v59 }
0x2e44   :  { %v2131_v14 = vpop.eup %2130 }
0x2e45   :  { %1740 = vrot.lane.b32.xlu2 %v2131_v14, %s2140_s0 }
0x2e46   :  { %v2133_v61 = vpop.eup %2132 }
0x2e47   :  { %v1721_v62 = vadd.f32 1.0, %v2133_v61 }
0x2e49   :  { %2134 = vrcp.f32 %v1721_v62  ;;  %v1733_v8 = vand.u32 2147483648, %v1721_v62  ;;  %vm1727_vm4 = vweird.f32 %v1721_v62  ;;  %v1731_v0 = vand.u32 2147483647, %v1721_v62 }
0x2e4b   :  { %v1734_v9 = vor.u32 1.1754944e-38, %v1733_v8  ;;  %vm1732_vm6 = vcmp.eq.f32.partialorder %v1731_v0, 8.507059e+37 }
0x2e4f   :  { %v2135_v17 = vpop.eup %2134 }
0x2e50   :  { %v1723_v28 = vmul.f32 %v2135_v17, %v1721_v62  ;;  %vm1728_vm3 = vweird.f32 %v2135_v17 }
0x2e51   :  { %vm1729_vm5 = vmor %vm1727_vm4, %vm1728_vm3 }
0x2e52   :  { %v1724_v18 = vsub.f32 1.0, %v1723_v28 }
0x2e54   :  { %v1725_v2 = vmul.f32 %v2135_v17, %v1724_v18 }
0x2e56   :  { %v1726_v6 = vadd.f32 %v2135_v17, %v1725_v2 }
0x2e58   :  { %v1730_v19 = vsel %vm1729_vm5, %v2135_v17, %v1726_v6 }
0x2e59   :  { %v1735_v11 = vsel %vm1732_vm6, %v1734_v9, %v1730_v19 }
0x2e5a   :  { %v1738_v23 = vmul.f32 %v1735_v11, %v1685_v56 }
0x2e9f   :  { %v1741_v20 = vpop.permute.xlu2 %1740 }
0x2ea0   :  { %v1743_v21 = vmul.f32 %v1741_v20, %v1735_v11 }
0x2ea2   :  { %1745 = vrot.lane.b32.xlu0 %v1743_v21, %s2141_s3 }
0x2f14   :  { %v1746_v25 = vpop.permute.xlu0 %1745 }
0x2f15   :  { %v1748_v32 = vadd.f32 %v1746_v25, %v1738_v23 }
0x2f17   :  { %2136 = vtanh.f32 %v1748_v32 }
0x2f1d   :  { %v2137_v30 = vpop.eup %2136 }
0x2f1e   :  { %1751 = vrot.lane.b32.xlu1 %v2137_v30, %s2140_s0 }
0x2f90   :  { %v1752_v34 = vpop.permute.xlu1 %1751 }
0x2f91   :  { %v1754_v35 = vmul.f32 %v1752_v34, %v1735_v11 }
0x2f93   :  { %1764 = vrot.lane.b32.xlu2 %v1754_v35, %s2141_s3 }
0x2fed   :  { %v1765_v38 = vpop.permute.xlu2 %1764 }
0x2fee   :  { %1934 = vmatmul.msk.f32.vlgmr.msrb.gmra.mxu0 %vm69_vm0, %v1765_v38 }
0x306b   :  { %v1785_v10 = vpop.f32.mrf.mxu0 }
0x306c   :  { %v1786_v42 = vadd.f32 %v1943_v22, %v1785_v10 }
0x306e   :  { %v1788_v44 = vmax.f32 %v1786_v42, 0.0 }
0x3070   :  { %1935 = vmatmul.msk.f32.vlgmr.msra.gmra.mxu2 %vm69_vm0, %v1788_v44  ;;  %vm1831_vm0 = vcmask 392192  }
0x30f3   :  { %v1817_v47 = vpop.f32.mrf.mxu2 }
0x30f4   :  { %v1818_v48 = vadd.f32 %v1944_v46, %v1817_v47 }
0x30f6   :  { %v1820_v49 = vmax.f32 %v1818_v48, 0.0 }
0x30f8   :  { %1936 = vmatmul.msk.f32.vlgmr.msra.gmra.mxu3 %vm1831_vm0, %v1820_v49 }
0x317b   :  { %v1852_v52 = vpop.f32.mrf.mxu3 }
0x317c   :  { %v1853_v53 = vadd.f32 %v1945_v50, %v1852_v52 }
0x317e   :  { %v1858_v55 = vmax.f32 %v1853_v53, 0.0 }
0x3180   :  { %v1859_v58 = vsel %vm1857_vm7, %v1858_v55, %v1853_v53 }
0x3181   :  { %1860 = vst [vmem:[%s2763_s16] sm:$0xff] %v1859_v58 }

</bundles_post_ra>
